<compile_context>
chip_gen: v7x
topology: tpu7x:2x2x1
jax: 0.10.0
libtpu: 0.0.40
codegen_flags: <defaults>
</compile_context>

<pallas_src>
import jax
import jax.numpy as jnp
from jax.experimental import pallas as pl
from jax.experimental.pallas import tpu as pltpu


_VMEM_SPEC = pl.BlockSpec(memory_space=pltpu.MemorySpace.VMEM)


def _make_fused_kernel(num_layers, B, T, H):
    """Build a fused LSTM(num_layers)+FC kernel.

    Kernel refs (in order):
      x_ref  [T*B, D_in] f32   (time-major: row t*B + b)
      per layer: wih_t [D_prev, 4H] bf16, whh_t [H, 4H] bf16, b [1, 4H] f32
      wfc_t [H, num_keys] bf16, bfc [1, num_keys] f32
      out_ref [B, num_keys] f32

    Weight columns are in gate order (i, f, o, g) (permuted host-side from
    PyTorch's (i, f, g, o)).
    """
    f32 = jnp.float32
    bf16 = jnp.bfloat16

    def kernel(*refs):
        x_ref = refs[0]
        layer_refs = refs[1:1 + 3 * num_layers]
        wfc_ref = refs[1 + 3 * num_layers]
        bfc_ref = refs[2 + 3 * num_layers]
        out_ref = refs[3 + 3 * num_layers]

        # ---- small weights as values (a few vregs each at H=32) ------------
        wih0 = layer_refs[0][...]                      # [D_in, 4H] bf16
        b0 = layer_refs[2][...]                        # [1, 4H]    f32
        whh = [layer_refs[3 * l + 1][...] for l in range(num_layers)]   # bf16
        wih = [layer_refs[3 * l][...] for l in range(1, num_layers)]    # bf16
        bs = [layer_refs[3 * l + 2][...] for l in range(num_layers)]    # f32
        d_in = wih0.shape[0]

        # ---- Layer-0 input projection, hoisted, as VPU broadcast-FMA -------
        # (K = d_in is tiny; avoids an MXU weight push entirely.)
        x = x_ref[...]                                 # [T*B, d_in] f32
        xp0 = b0 + x[:, 0:1] * wih0[0:1, :].astype(f32)
        for d in range(1, d_in):
            xp0 = xp0 + x[:, d:d + 1] * wih0[d:d + 1, :].astype(f32)
        # xp0: [T*B, 4H] f32, time-major.

        def cell(gates, c):
            # gates [B, 4H] f32 in (i, f, o, g) order.
            sig = jax.nn.sigmoid(gates[:, :3 * H])     # i | f | o
            g = jnp.tanh(gates[:, 3 * H:])             # g
            c_new = sig[:, H:2 * H] * c + sig[:, :H] * g
            h_new = sig[:, 2 * H:] * jnp.tanh(c_new)
            return h_new, c_new

        h = [jnp.zeros((B, H), f32) for _ in range(num_layers)]
        c = [jnp.zeros((B, H), f32) for _ in range(num_layers)]

        # ---- Wavefront over time: all layers advance inside one t-loop -----
        # (fully unrolled; h/c live in vregs, no scratch traffic)
        for t in range(T):
            # Layer 0: hoisted input projection + recurrent matmul.
            gates = xp0[t * B:(t + 1) * B, :] + jnp.dot(
                h[0].astype(bf16), whh[0], preferred_element_type=f32)
            h[0], c[0] = cell(gates, c[0])
            # Layers 1..L-1: per-step input projection fused here so layer l
            # at step t depends only on layer l-1 step t and its own step t-1.
            for l in range(1, num_layers):
                gates = (bs[l]
                         + jnp.dot(h[l - 1].astype(bf16), wih[l - 1],
                                   preferred_element_type=f32)
                         + jnp.dot(h[l].astype(bf16), whh[l],
                                   preferred_element_type=f32))
                h[l], c[l] = cell(gates, c[l])

        # ---- Fused FC on the last timestep's hidden state -------------------
        out_ref[...] = (jnp.dot(h[-1].astype(bf16), wfc_ref[...],
                                preferred_element_type=f32)
                        + bfc_ref[...])

    return kernel


@jax.jit
def model_forward(x, kernel_layer_params, kernel_fc_params):
    """x: [B, T, input_size] float32, batch-first (PyTorch convention)."""
    B, T, d_in = x.shape
    num_layers = len(kernel_layer_params)
    H = kernel_layer_params[0][1].shape[0]
    wfc_t, bfc = kernel_fc_params
    num_keys = wfc_t.shape[1]

    # Wrapper-side layout plumbing: time-major flatten so each timestep's rows
    # are contiguous inside the kernel (no in-kernel relayout reshape).
    x_flat = jnp.transpose(x, (1, 0, 2)).reshape(T * B, d_in).astype(jnp.float32)

    flat_params = []
    for wih_t, whh_t, b in kernel_layer_params:
        flat_params.extend((wih_t, whh_t, b))

    # TODO(synk): for serving batches (B >= 16), add a leading batch-tile grid
    # axis with dimension_semantics=("parallel",) to shard across v7x cores.
    return pl.pallas_call(
        _make_fused_kernel(num_layers, B, T, H),
        out_shape=jax.ShapeDtypeStruct((B, num_keys), jnp.float32),
        in_specs=[_VMEM_SPEC] * (1 + 3 * num_layers + 2),
        out_specs=_VMEM_SPEC,
    )(x_flat, *flat_params, wfc_t, bfc)


def init_params(key, input_size, hidden_size, num_layers, num_keys):
    """Raw PyTorch-layout params: uniform(-k, k), k = 1/sqrt(H)."""
    k = 1.0 / jnp.sqrt(jnp.float32(hidden_size))
    layer_params = []
    for layer in range(num_layers):
        d_in = input_size if layer == 0 else hidden_size
        key, k1, k2, k3, k4 = jax.random.split(key, 5)
        w_ih = jax.random.uniform(k1, (4 * hidden_size, d_in), jnp.float32, -k, k)
        w_hh = jax.random.uniform(k2, (4 * hidden_size, hidden_size), jnp.float32, -k, k)
        b_ih = jax.random.uniform(k3, (4 * hidden_size,), jnp.float32, -k, k)
        b_hh = jax.random.uniform(k4, (4 * hidden_size,), jnp.float32, -k, k)
        layer_params.append((w_ih, w_hh, b_ih, b_hh))
    key, k5, k6 = jax.random.split(key, 3)
    w_fc = jax.random.uniform(k5, (num_keys, hidden_size), jnp.float32, -k, k)
    b_fc = jax.random.uniform(k6, (num_keys,), jnp.float32, -k, k)
    return layer_params, (w_fc, b_fc)


def prepare_kernel_params(raw_layer_params, raw_fc_params, hidden_size):
    """Transpose weights, combine biases, permute gates (i,f,g,o)->(i,f,o,g),
    and cast weight matrices to bf16 (f32 accumulation happens in-kernel)."""
    H = hidden_size
    perm = jnp.concatenate([jnp.arange(0, 2 * H),       # i, f
                            jnp.arange(3 * H, 4 * H),   # o
                            jnp.arange(2 * H, 3 * H)])  # g
    kernel_layers = []
    for w_ih, w_hh, b_ih, b_hh in raw_layer_params:
        kernel_layers.append((
            w_ih.T[:, perm].astype(jnp.bfloat16),
            w_hh.T[:, perm].astype(jnp.bfloat16),
            ((b_ih + b_hh)[perm][None, :]).astype(jnp.float32),
        ))
    w_fc, b_fc = raw_fc_params
    return kernel_layers, (w_fc.T.astype(jnp.bfloat16),
                           b_fc[None, :].astype(jnp.float32))


def _reference_forward(x, raw_layer_params, raw_fc_params):
    """Pure-JAX f32 reference mirroring PyTorch nn.LSTM (i,f,g,o) + nn.Linear."""
    B = x.shape[0]
    seq = x
    for w_ih, w_hh, b_ih, b_hh in raw_layer_params:
        H = w_hh.shape[1]
        h = jnp.zeros((B, H), jnp.float32)
        c = jnp.zeros((B, H), jnp.float32)
        outs = []
        for t in range(seq.shape[1]):
            gates = seq[:, t, :] @ w_ih.T + h @ w_hh.T + b_ih + b_hh
            i = jax.nn.sigmoid(gates[:, :H])
            f = jax.nn.sigmoid(gates[:, H:2 * H])
            g = jnp.tanh(gates[:, 2 * H:3 * H])
            o = jax.nn.sigmoid(gates[:, 3 * H:])
            c = f * c + i * g
            h = o * jnp.tanh(c)
            outs.append(h)
        seq = jnp.stack(outs, axis=1)
    w_fc, b_fc = raw_fc_params
    return seq[:, -1, :] @ w_fc.T + b_fc


if __name__ == "__main__":
    # Small shapes consistent with the module's forward.
    batch, seq_len = 2, 8
    input_size, hidden_size, num_layers, num_keys = 4, 32, 2, 8

    key = jax.random.PRNGKey(0)
    key, xkey = jax.random.split(key)
    x = jax.random.normal(xkey, (batch, seq_len, input_size), jnp.float32)

    raw_layers, raw_fc = init_params(
        key, input_size, hidden_size, num_layers, num_keys)
    kernel_layers, kernel_fc = prepare_kernel_params(
        raw_layers, raw_fc, hidden_size)

    out = model_forward(x, kernel_layers, kernel_fc)
    out = jax.block_until_ready(out)

    ref = _reference_forward(x, raw_layers, raw_fc)
    assert out.shape == (batch, num_keys)
    # Tolerance loosened vs. the f32 reference because weights / matmul LHS are
    # bf16 in the kernel (observed error is ~1e-3; margin is generous).
    assert jnp.allclose(out, ref, atol=3e-2, rtol=3e-2), "mismatch vs reference"

    print("KERNEL_OK")
</pallas_src>

<mosaic_0001>
module attributes {stable_mosaic.version = 11 : i64} {
  func.func @kernel(%arg0: memref<16x4xf32, #tpu.memory_space<vmem>>, %arg1: memref<4x128xbf16, #tpu.memory_space<vmem>>, %arg2: memref<32x128xbf16, #tpu.memory_space<vmem>>, %arg3: memref<1x128xf32, #tpu.memory_space<vmem>>, %arg4: memref<32x128xbf16, #tpu.memory_space<vmem>>, %arg5: memref<32x128xbf16, #tpu.memory_space<vmem>>, %arg6: memref<1x128xf32, #tpu.memory_space<vmem>>, %arg7: memref<32x8xbf16, #tpu.memory_space<vmem>>, %arg8: memref<1x8xf32, #tpu.memory_space<vmem>>, %arg9: memref<2x8xf32, #tpu.memory_space<vmem>>) attributes {dimension_semantics = [], scalar_prefetch = 0 : i64, scratch_operands = 0 : i64, tpu.core_type = #tpu.core_type<tc>} {
    %c0 = arith.constant 0 : index
    %c0_0 = arith.constant 0 : index
    %0 = vector.load %arg1[%c0, %c0_0] : memref<4x128xbf16, #tpu.memory_space<vmem>>, vector<4x128xbf16>
    %c0_1 = arith.constant 0 : index
    %c0_2 = arith.constant 0 : index
    %1 = vector.load %arg3[%c0_1, %c0_2] : memref<1x128xf32, #tpu.memory_space<vmem>>, vector<1x128xf32>
    %c0_3 = arith.constant 0 : index
    %c0_4 = arith.constant 0 : index
    %2 = vector.load %arg2[%c0_3, %c0_4] : memref<32x128xbf16, #tpu.memory_space<vmem>>, vector<32x128xbf16>
    %c0_5 = arith.constant 0 : index
    %c0_6 = arith.constant 0 : index
    %3 = vector.load %arg5[%c0_5, %c0_6] : memref<32x128xbf16, #tpu.memory_space<vmem>>, vector<32x128xbf16>
    %c0_7 = arith.constant 0 : index
    %c0_8 = arith.constant 0 : index
    %4 = vector.load %arg4[%c0_7, %c0_8] : memref<32x128xbf16, #tpu.memory_space<vmem>>, vector<32x128xbf16>
    %c0_9 = arith.constant 0 : index
    %c0_10 = arith.constant 0 : index
    %5 = vector.load %arg6[%c0_9, %c0_10] : memref<1x128xf32, #tpu.memory_space<vmem>>, vector<1x128xf32>
    %c0_11 = arith.constant 0 : index
    %c0_12 = arith.constant 0 : index
    %6 = vector.load %arg0[%c0_11, %c0_12] : memref<16x4xf32, #tpu.memory_space<vmem>>, vector<16x4xf32>
    %7 = vector.extract_strided_slice %6 {offsets = [0, 0], sizes = [16, 1], strides = [1, 1]} : vector<16x4xf32> to vector<16x1xf32>
    %8 = vector.extract_strided_slice %0 {offsets = [0, 0], sizes = [1, 128], strides = [1, 1]} : vector<4x128xbf16> to vector<1x128xbf16>
    %9 = arith.extf %8 : vector<1x128xbf16> to vector<1x128xf32>
    %10 = vector.broadcast %7 : vector<16x1xf32> to vector<16x128xf32>
    %11 = vector.broadcast %9 : vector<1x128xf32> to vector<16x128xf32>
    %12 = arith.mulf %10, %11 : vector<16x128xf32>
    %13 = vector.broadcast %1 : vector<1x128xf32> to vector<16x128xf32>
    %14 = arith.addf %13, %12 : vector<16x128xf32>
    %15 = vector.extract_strided_slice %6 {offsets = [0, 1], sizes = [16, 1], strides = [1, 1]} : vector<16x4xf32> to vector<16x1xf32>
    %16 = vector.extract_strided_slice %0 {offsets = [1, 0], sizes = [1, 128], strides = [1, 1]} : vector<4x128xbf16> to vector<1x128xbf16>
    %17 = arith.extf %16 : vector<1x128xbf16> to vector<1x128xf32>
    %18 = vector.broadcast %15 : vector<16x1xf32> to vector<16x128xf32>
    %19 = vector.broadcast %17 : vector<1x128xf32> to vector<16x128xf32>
    %20 = arith.mulf %18, %19 : vector<16x128xf32>
    %21 = arith.addf %14, %20 : vector<16x128xf32>
    %22 = vector.extract_strided_slice %6 {offsets = [0, 2], sizes = [16, 1], strides = [1, 1]} : vector<16x4xf32> to vector<16x1xf32>
    %23 = vector.extract_strided_slice %0 {offsets = [2, 0], sizes = [1, 128], strides = [1, 1]} : vector<4x128xbf16> to vector<1x128xbf16>
    %24 = arith.extf %23 : vector<1x128xbf16> to vector<1x128xf32>
    %25 = vector.broadcast %22 : vector<16x1xf32> to vector<16x128xf32>
    %26 = vector.broadcast %24 : vector<1x128xf32> to vector<16x128xf32>
    %27 = arith.mulf %25, %26 : vector<16x128xf32>
    %28 = arith.addf %21, %27 : vector<16x128xf32>
    %29 = vector.extract_strided_slice %6 {offsets = [0, 3], sizes = [16, 1], strides = [1, 1]} : vector<16x4xf32> to vector<16x1xf32>
    %30 = vector.extract_strided_slice %0 {offsets = [3, 0], sizes = [1, 128], strides = [1, 1]} : vector<4x128xbf16> to vector<1x128xbf16>
    %31 = arith.extf %30 : vector<1x128xbf16> to vector<1x128xf32>
    %32 = vector.broadcast %29 : vector<16x1xf32> to vector<16x128xf32>
    %33 = vector.broadcast %31 : vector<1x128xf32> to vector<16x128xf32>
    %34 = arith.mulf %32, %33 : vector<16x128xf32>
    %35 = arith.addf %28, %34 : vector<16x128xf32>
    %cst = arith.constant 0.000000e+00 : f32
    %36 = vector.broadcast %cst : f32 to vector<2x32xf32>
    %cst_13 = arith.constant 0.000000e+00 : f32
    %37 = vector.broadcast %cst_13 : f32 to vector<2x32xf32>
    %cst_14 = arith.constant 0.000000e+00 : f32
    %38 = vector.broadcast %cst_14 : f32 to vector<2x32xf32>
    %cst_15 = arith.constant 0.000000e+00 : f32
    %39 = vector.broadcast %cst_15 : f32 to vector<2x32xf32>
    %40 = vector.extract_strided_slice %35 {offsets = [0, 0], sizes = [2, 128], strides = [1, 1]} : vector<16x128xf32> to vector<2x128xf32>
    %41 = arith.truncf %36 : vector<2x32xf32> to vector<2x32xbf16>
    %cst_16 = arith.constant dense<0.000000e+00> : vector<2x128xf32>
    %42 = tpu.matmul %41, %2, %cst_16 {dimension_numbers = #tpu.dot_dimension_numbers<[1], [0], [0], [1], [0, 0, 1, 1], [], []>} : vector<2x32xbf16>, vector<32x128xbf16>, vector<2x128xf32> -> vector<2x128xf32>
    %43 = arith.addf %40, %42 : vector<2x128xf32>
    %44 = vector.extract_strided_slice %43 {offsets = [0, 0], sizes = [2, 96], strides = [1, 1]} : vector<2x128xf32> to vector<2x96xf32>
    %45 = arith.negf %44 : vector<2x96xf32>
    %46 = math.exp %45 : vector<2x96xf32>
    %cst_17 = arith.constant 1.000000e+00 : f32
    %47 = vector.broadcast %cst_17 : f32 to vector<2x96xf32>
    %48 = arith.addf %47, %46 : vector<2x96xf32>
    %49 = arith.divf %47, %48 : vector<2x96xf32>
    %50 = vector.extract_strided_slice %43 {offsets = [0, 96], sizes = [2, 32], strides = [1, 1]} : vector<2x128xf32> to vector<2x32xf32>
    %51 = math.tanh %50 : vector<2x32xf32>
    %52 = vector.extract_strided_slice %49 {offsets = [0, 32], sizes = [2, 32], strides = [1, 1]} : vector<2x96xf32> to vector<2x32xf32>
    %53 = arith.mulf %52, %38 : vector<2x32xf32>
    %54 = vector.extract_strided_slice %49 {offsets = [0, 0], sizes = [2, 32], strides = [1, 1]} : vector<2x96xf32> to vector<2x32xf32>
    %55 = arith.mulf %54, %51 : vector<2x32xf32>
    %56 = arith.addf %53, %55 : vector<2x32xf32>
    %57 = vector.extract_strided_slice %49 {offsets = [0, 64], sizes = [2, 32], strides = [1, 1]} : vector<2x96xf32> to vector<2x32xf32>
    %58 = math.tanh %56 : vector<2x32xf32>
    %59 = arith.mulf %57, %58 : vector<2x32xf32>
    %60 = arith.truncf %59 : vector<2x32xf32> to vector<2x32xbf16>
    %cst_18 = arith.constant dense<0.000000e+00> : vector<2x128xf32>
    %61 = tpu.matmul %60, %4, %cst_18 {dimension_numbers = #tpu.dot_dimension_numbers<[1], [0], [0], [1], [0, 0, 1, 1], [], []>} : vector<2x32xbf16>, vector<32x128xbf16>, vector<2x128xf32> -> vector<2x128xf32>
    %62 = vector.broadcast %5 : vector<1x128xf32> to vector<2x128xf32>
    %63 = arith.addf %62, %61 : vector<2x128xf32>
    %64 = arith.truncf %37 : vector<2x32xf32> to vector<2x32xbf16>
    %cst_19 = arith.constant dense<0.000000e+00> : vector<2x128xf32>
    %65 = tpu.matmul %64, %3, %cst_19 {dimension_numbers = #tpu.dot_dimension_numbers<[1], [0], [0], [1], [0, 0, 1, 1], [], []>} : vector<2x32xbf16>, vector<32x128xbf16>, vector<2x128xf32> -> vector<2x128xf32>
    %66 = arith.addf %63, %65 : vector<2x128xf32>
    %67 = vector.extract_strided_slice %66 {offsets = [0, 0], sizes = [2, 96], strides = [1, 1]} : vector<2x128xf32> to vector<2x96xf32>
    %68 = arith.negf %67 : vector<2x96xf32>
    %69 = math.exp %68 : vector<2x96xf32>
    %cst_20 = arith.constant 1.000000e+00 : f32
    %70 = vector.broadcast %cst_20 : f32 to vector<2x96xf32>
    %71 = arith.addf %70, %69 : vector<2x96xf32>
    %72 = arith.divf %70, %71 : vector<2x96xf32>
    %73 = vector.extract_strided_slice %66 {offsets = [0, 96], sizes = [2, 32], strides = [1, 1]} : vector<2x128xf32> to vector<2x32xf32>
    %74 = math.tanh %73 : vector<2x32xf32>
    %75 = vector.extract_strided_slice %72 {offsets = [0, 32], sizes = [2, 32], strides = [1, 1]} : vector<2x96xf32> to vector<2x32xf32>
    %76 = arith.mulf %75, %39 : vector<2x32xf32>
    %77 = vector.extract_strided_slice %72 {offsets = [0, 0], sizes = [2, 32], strides = [1, 1]} : vector<2x96xf32> to vector<2x32xf32>
    %78 = arith.mulf %77, %74 : vector<2x32xf32>
    %79 = arith.addf %76, %78 : vector<2x32xf32>
    %80 = vector.extract_strided_slice %72 {offsets = [0, 64], sizes = [2, 32], strides = [1, 1]} : vector<2x96xf32> to vector<2x32xf32>
    %81 = math.tanh %79 : vector<2x32xf32>
    %82 = arith.mulf %80, %81 : vector<2x32xf32>
    %83 = vector.extract_strided_slice %35 {offsets = [2, 0], sizes = [2, 128], strides = [1, 1]} : vector<16x128xf32> to vector<2x128xf32>
    %84 = arith.truncf %59 : vector<2x32xf32> to vector<2x32xbf16>
    %cst_21 = arith.constant dense<0.000000e+00> : vector<2x128xf32>
    %85 = tpu.matmul %84, %2, %cst_21 {dimension_numbers = #tpu.dot_dimension_numbers<[1], [0], [0], [1], [0, 0, 1, 1], [], []>} : vector<2x32xbf16>, vector<32x128xbf16>, vector<2x128xf32> -> vector<2x128xf32>
    %86 = arith.addf %83, %85 : vector<2x128xf32>
    %87 = vector.extract_strided_slice %86 {offsets = [0, 0], sizes = [2, 96], strides = [1, 1]} : vector<2x128xf32> to vector<2x96xf32>
    %88 = arith.negf %87 : vector<2x96xf32>
    %89 = math.exp %88 : vector<2x96xf32>
    %cst_22 = arith.constant 1.000000e+00 : f32
    %90 = vector.broadcast %cst_22 : f32 to vector<2x96xf32>
    %91 = arith.addf %90, %89 : vector<2x96xf32>
    %92 = arith.divf %90, %91 : vector<2x96xf32>
    %93 = vector.extract_strided_slice %86 {offsets = [0, 96], sizes = [2, 32], strides = [1, 1]} : vector<2x128xf32> to vector<2x32xf32>
    %94 = math.tanh %93 : vector<2x32xf32>
    %95 = vector.extract_strided_slice %92 {offsets = [0, 32], sizes = [2, 32], strides = [1, 1]} : vector<2x96xf32> to vector<2x32xf32>
    %96 = arith.mulf %95, %56 : vector<2x32xf32>
    %97 = vector.extract_strided_slice %92 {offsets = [0, 0], sizes = [2, 32], strides = [1, 1]} : vector<2x96xf32> to vector<2x32xf32>
    %98 = arith.mulf %97, %94 : vector<2x32xf32>
    %99 = arith.addf %96, %98 : vector<2x32xf32>
    %100 = vector.extract_strided_slice %92 {offsets = [0, 64], sizes = [2, 32], strides = [1, 1]} : vector<2x96xf32> to vector<2x32xf32>
    %101 = math.tanh %99 : vector<2x32xf32>
    %102 = arith.mulf %100, %101 : vector<2x32xf32>
    %103 = arith.truncf %102 : vector<2x32xf32> to vector<2x32xbf16>
    %cst_23 = arith.constant dense<0.000000e+00> : vector<2x128xf32>
    %104 = tpu.matmul %103, %4, %cst_23 {dimension_numbers = #tpu.dot_dimension_numbers<[1], [0], [0], [1], [0, 0, 1, 1], [], []>} : vector<2x32xbf16>, vector<32x128xbf16>, vector<2x128xf32> -> vector<2x128xf32>
    %105 = vector.broadcast %5 : vector<1x128xf32> to vector<2x128xf32>
    %106 = arith.addf %105, %104 : vector<2x128xf32>
    %107 = arith.truncf %82 : vector<2x32xf32> to vector<2x32xbf16>
    %cst_24 = arith.constant dense<0.000000e+00> : vector<2x128xf32>
    %108 = tpu.matmul %107, %3, %cst_24 {dimension_numbers = #tpu.dot_dimension_numbers<[1], [0], [0], [1], [0, 0, 1, 1], [], []>} : vector<2x32xbf16>, vector<32x128xbf16>, vector<2x128xf32> -> vector<2x128xf32>
    %109 = arith.addf %106, %108 : vector<2x128xf32>
    %110 = vector.extract_strided_slice %109 {offsets = [0, 0], sizes = [2, 96], strides = [1, 1]} : vector<2x128xf32> to vector<2x96xf32>
    %111 = arith.negf %110 : vector<2x96xf32>
    %112 = math.exp %111 : vector<2x96xf32>
    %cst_25 = arith.constant 1.000000e+00 : f32
    %113 = vector.broadcast %cst_25 : f32 to vector<2x96xf32>
    %114 = arith.addf %113, %112 : vector<2x96xf32>
    %115 = arith.divf %113, %114 : vector<2x96xf32>
    %116 = vector.extract_strided_slice %109 {offsets = [0, 96], sizes = [2, 32], strides = [1, 1]} : vector<2x128xf32> to vector<2x32xf32>
    %117 = math.tanh %116 : vector<2x32xf32>
    %118 = vector.extract_strided_slice %115 {offsets = [0, 32], sizes = [2, 32], strides = [1, 1]} : vector<2x96xf32> to vector<2x32xf32>
    %119 = arith.mulf %118, %79 : vector<2x32xf32>
    %120 = vector.extract_strided_slice %115 {offsets = [0, 0], sizes = [2, 32], strides = [1, 1]} : vector<2x96xf32> to vector<2x32xf32>
    %121 = arith.mulf %120, %117 : vector<2x32xf32>
    %122 = arith.addf %119, %121 : vector<2x32xf32>
    %123 = vector.extract_strided_slice %115 {offsets = [0, 64], sizes = [2, 32], strides = [1, 1]} : vector<2x96xf32> to vector<2x32xf32>
    %124 = math.tanh %122 : vector<2x32xf32>
    %125 = arith.mulf %123, %124 : vector<2x32xf32>
    %126 = vector.extract_strided_slice %35 {offsets = [4, 0], sizes = [2, 128], strides = [1, 1]} : vector<16x128xf32> to vector<2x128xf32>
    %127 = arith.truncf %102 : vector<2x32xf32> to vector<2x32xbf16>
    %cst_26 = arith.constant dense<0.000000e+00> : vector<2x128xf32>
    %128 = tpu.matmul %127, %2, %cst_26 {dimension_numbers = #tpu.dot_dimension_numbers<[1], [0], [0], [1], [0, 0, 1, 1], [], []>} : vector<2x32xbf16>, vector<32x128xbf16>, vector<2x128xf32> -> vector<2x128xf32>
    %129 = arith.addf %126, %128 : vector<2x128xf32>
    %130 = vector.extract_strided_slice %129 {offsets = [0, 0], sizes = [2, 96], strides = [1, 1]} : vector<2x128xf32> to vector<2x96xf32>
    %131 = arith.negf %130 : vector<2x96xf32>
    %132 = math.exp %131 : vector<2x96xf32>
    %cst_27 = arith.constant 1.000000e+00 : f32
    %133 = vector.broadcast %cst_27 : f32 to vector<2x96xf32>
    %134 = arith.addf %133, %132 : vector<2x96xf32>
    %135 = arith.divf %133, %134 : vector<2x96xf32>
    %136 = vector.extract_strided_slice %129 {offsets = [0, 96], sizes = [2, 32], strides = [1, 1]} : vector<2x128xf32> to vector<2x32xf32>
    %137 = math.tanh %136 : vector<2x32xf32>
    %138 = vector.extract_strided_slice %135 {offsets = [0, 32], sizes = [2, 32], strides = [1, 1]} : vector<2x96xf32> to vector<2x32xf32>
    %139 = arith.mulf %138, %99 : vector<2x32xf32>
    %140 = vector.extract_strided_slice %135 {offsets = [0, 0], sizes = [2, 32], strides = [1, 1]} : vector<2x96xf32> to vector<2x32xf32>
    %141 = arith.mulf %140, %137 : vector<2x32xf32>
    %142 = arith.addf %139, %141 : vector<2x32xf32>
    %143 = vector.extract_strided_slice %135 {offsets = [0, 64], sizes = [2, 32], strides = [1, 1]} : vector<2x96xf32> to vector<2x32xf32>
    %144 = math.tanh %142 : vector<2x32xf32>
    %145 = arith.mulf %143, %144 : vector<2x32xf32>
    %146 = arith.truncf %145 : vector<2x32xf32> to vector<2x32xbf16>
    %cst_28 = arith.constant dense<0.000000e+00> : vector<2x128xf32>
    %147 = tpu.matmul %146, %4, %cst_28 {dimension_numbers = #tpu.dot_dimension_numbers<[1], [0], [0], [1], [0, 0, 1, 1], [], []>} : vector<2x32xbf16>, vector<32x128xbf16>, vector<2x128xf32> -> vector<2x128xf32>
    %148 = vector.broadcast %5 : vector<1x128xf32> to vector<2x128xf32>
    %149 = arith.addf %148, %147 : vector<2x128xf32>
    %150 = arith.truncf %125 : vector<2x32xf32> to vector<2x32xbf16>
    %cst_29 = arith.constant dense<0.000000e+00> : vector<2x128xf32>
    %151 = tpu.matmul %150, %3, %cst_29 {dimension_numbers = #tpu.dot_dimension_numbers<[1], [0], [0], [1], [0, 0, 1, 1], [], []>} : vector<2x32xbf16>, vector<32x128xbf16>, vector<2x128xf32> -> vector<2x128xf32>
    %152 = arith.addf %149, %151 : vector<2x128xf32>
    %153 = vector.extract_strided_slice %152 {offsets = [0, 0], sizes = [2, 96], strides = [1, 1]} : vector<2x128xf32> to vector<2x96xf32>
    %154 = arith.negf %153 : vector<2x96xf32>
    %155 = math.exp %154 : vector<2x96xf32>
    %cst_30 = arith.constant 1.000000e+00 : f32
    %156 = vector.broadcast %cst_30 : f32 to vector<2x96xf32>
    %157 = arith.addf %156, %155 : vector<2x96xf32>
    %158 = arith.divf %156, %157 : vector<2x96xf32>
    %159 = vector.extract_strided_slice %152 {offsets = [0, 96], sizes = [2, 32], strides = [1, 1]} : vector<2x128xf32> to vector<2x32xf32>
    %160 = math.tanh %159 : vector<2x32xf32>
    %161 = vector.extract_strided_slice %158 {offsets = [0, 32], sizes = [2, 32], strides = [1, 1]} : vector<2x96xf32> to vector<2x32xf32>
    %162 = arith.mulf %161, %122 : vector<2x32xf32>
    %163 = vector.extract_strided_slice %158 {offsets = [0, 0], sizes = [2, 32], strides = [1, 1]} : vector<2x96xf32> to vector<2x32xf32>
    %164 = arith.mulf %163, %160 : vector<2x32xf32>
    %165 = arith.addf %162, %164 : vector<2x32xf32>
    %166 = vector.extract_strided_slice %158 {offsets = [0, 64], sizes = [2, 32], strides = [1, 1]} : vector<2x96xf32> to vector<2x32xf32>
    %167 = math.tanh %165 : vector<2x32xf32>
    %168 = arith.mulf %166, %167 : vector<2x32xf32>
    %169 = vector.extract_strided_slice %35 {offsets = [6, 0], sizes = [2, 128], strides = [1, 1]} : vector<16x128xf32> to vector<2x128xf32>
    %170 = arith.truncf %145 : vector<2x32xf32> to vector<2x32xbf16>
    %cst_31 = arith.constant dense<0.000000e+00> : vector<2x128xf32>
    %171 = tpu.matmul %170, %2, %cst_31 {dimension_numbers = #tpu.dot_dimension_numbers<[1], [0], [0], [1], [0, 0, 1, 1], [], []>} : vector<2x32xbf16>, vector<32x128xbf16>, vector<2x128xf32> -> vector<2x128xf32>
    %172 = arith.addf %169, %171 : vector<2x128xf32>
    %173 = vector.extract_strided_slice %172 {offsets = [0, 0], sizes = [2, 96], strides = [1, 1]} : vector<2x128xf32> to vector<2x96xf32>
    %174 = arith.negf %173 : vector<2x96xf32>
    %175 = math.exp %174 : vector<2x96xf32>
    %cst_32 = arith.constant 1.000000e+00 : f32
    %176 = vector.broadcast %cst_32 : f32 to vector<2x96xf32>
    %177 = arith.addf %176, %175 : vector<2x96xf32>
    %178 = arith.divf %176, %177 : vector<2x96xf32>
    %179 = vector.extract_strided_slice %172 {offsets = [0, 96], sizes = [2, 32], strides = [1, 1]} : vector<2x128xf32> to vector<2x32xf32>
    %180 = math.tanh %179 : vector<2x32xf32>
    %181 = vector.extract_strided_slice %178 {offsets = [0, 32], sizes = [2, 32], strides = [1, 1]} : vector<2x96xf32> to vector<2x32xf32>
    %182 = arith.mulf %181, %142 : vector<2x32xf32>
    %183 = vector.extract_strided_slice %178 {offsets = [0, 0], sizes = [2, 32], strides = [1, 1]} : vector<2x96xf32> to vector<2x32xf32>
    %184 = arith.mulf %183, %180 : vector<2x32xf32>
    %185 = arith.addf %182, %184 : vector<2x32xf32>
    %186 = vector.extract_strided_slice %178 {offsets = [0, 64], sizes = [2, 32], strides = [1, 1]} : vector<2x96xf32> to vector<2x32xf32>
    %187 = math.tanh %185 : vector<2x32xf32>
    %188 = arith.mulf %186, %187 : vector<2x32xf32>
    %189 = arith.truncf %188 : vector<2x32xf32> to vector<2x32xbf16>
    %cst_33 = arith.constant dense<0.000000e+00> : vector<2x128xf32>
    %190 = tpu.matmul %189, %4, %cst_33 {dimension_numbers = #tpu.dot_dimension_numbers<[1], [0], [0], [1], [0, 0, 1, 1], [], []>} : vector<2x32xbf16>, vector<32x128xbf16>, vector<2x128xf32> -> vector<2x128xf32>
    %191 = vector.broadcast %5 : vector<1x128xf32> to vector<2x128xf32>
    %192 = arith.addf %191, %190 : vector<2x128xf32>
    %193 = arith.truncf %168 : vector<2x32xf32> to vector<2x32xbf16>
    %cst_34 = arith.constant dense<0.000000e+00> : vector<2x128xf32>
    %194 = tpu.matmul %193, %3, %cst_34 {dimension_numbers = #tpu.dot_dimension_numbers<[1], [0], [0], [1], [0, 0, 1, 1], [], []>} : vector<2x32xbf16>, vector<32x128xbf16>, vector<2x128xf32> -> vector<2x128xf32>
    %195 = arith.addf %192, %194 : vector<2x128xf32>
    %196 = vector.extract_strided_slice %195 {offsets = [0, 0], sizes = [2, 96], strides = [1, 1]} : vector<2x128xf32> to vector<2x96xf32>
    %197 = arith.negf %196 : vector<2x96xf32>
    %198 = math.exp %197 : vector<2x96xf32>
    %cst_35 = arith.constant 1.000000e+00 : f32
    %199 = vector.broadcast %cst_35 : f32 to vector<2x96xf32>
    %200 = arith.addf %199, %198 : vector<2x96xf32>
    %201 = arith.divf %199, %200 : vector<2x96xf32>
    %202 = vector.extract_strided_slice %195 {offsets = [0, 96], sizes = [2, 32], strides = [1, 1]} : vector<2x128xf32> to vector<2x32xf32>
    %203 = math.tanh %202 : vector<2x32xf32>
    %204 = vector.extract_strided_slice %201 {offsets = [0, 32], sizes = [2, 32], strides = [1, 1]} : vector<2x96xf32> to vector<2x32xf32>
    %205 = arith.mulf %204, %165 : vector<2x32xf32>
    %206 = vector.extract_strided_slice %201 {offsets = [0, 0], sizes = [2, 32], strides = [1, 1]} : vector<2x96xf32> to vector<2x32xf32>
    %207 = arith.mulf %206, %203 : vector<2x32xf32>
    %208 = arith.addf %205, %207 : vector<2x32xf32>
    %209 = vector.extract_strided_slice %201 {offsets = [0, 64], sizes = [2, 32], strides = [1, 1]} : vector<2x96xf32> to vector<2x32xf32>
    %210 = math.tanh %208 : vector<2x32xf32>
    %211 = arith.mulf %209, %210 : vector<2x32xf32>
    %212 = vector.extract_strided_slice %35 {offsets = [8, 0], sizes = [2, 128], strides = [1, 1]} : vector<16x128xf32> to vector<2x128xf32>
    %213 = arith.truncf %188 : vector<2x32xf32> to vector<2x32xbf16>
    %cst_36 = arith.constant dense<0.000000e+00> : vector<2x128xf32>
    %214 = tpu.matmul %213, %2, %cst_36 {dimension_numbers = #tpu.dot_dimension_numbers<[1], [0], [0], [1], [0, 0, 1, 1], [], []>} : vector<2x32xbf16>, vector<32x128xbf16>, vector<2x128xf32> -> vector<2x128xf32>
    %215 = arith.addf %212, %214 : vector<2x128xf32>
    %216 = vector.extract_strided_slice %215 {offsets = [0, 0], sizes = [2, 96], strides = [1, 1]} : vector<2x128xf32> to vector<2x96xf32>
    %217 = arith.negf %216 : vector<2x96xf32>
    %218 = math.exp %217 : vector<2x96xf32>
    %cst_37 = arith.constant 1.000000e+00 : f32
    %219 = vector.broadcast %cst_37 : f32 to vector<2x96xf32>
    %220 = arith.addf %219, %218 : vector<2x96xf32>
    %221 = arith.divf %219, %220 : vector<2x96xf32>
    %222 = vector.extract_strided_slice %215 {offsets = [0, 96], sizes = [2, 32], strides = [1, 1]} : vector<2x128xf32> to vector<2x32xf32>
    %223 = math.tanh %222 : vector<2x32xf32>
    %224 = vector.extract_strided_slice %221 {offsets = [0, 32], sizes = [2, 32], strides = [1, 1]} : vector<2x96xf32> to vector<2x32xf32>
    %225 = arith.mulf %224, %185 : vector<2x32xf32>
    %226 = vector.extract_strided_slice %221 {offsets = [0, 0], sizes = [2, 32], strides = [1, 1]} : vector<2x96xf32> to vector<2x32xf32>
    %227 = arith.mulf %226, %223 : vector<2x32xf32>
    %228 = arith.addf %225, %227 : vector<2x32xf32>
    %229 = vector.extract_strided_slice %221 {offsets = [0, 64], sizes = [2, 32], strides = [1, 1]} : vector<2x96xf32> to vector<2x32xf32>
    %230 = math.tanh %228 : vector<2x32xf32>
    %231 = arith.mulf %229, %230 : vector<2x32xf32>
    %232 = arith.truncf %231 : vector<2x32xf32> to vector<2x32xbf16>
    %cst_38 = arith.constant dense<0.000000e+00> : vector<2x128xf32>
    %233 = tpu.matmul %232, %4, %cst_38 {dimension_numbers = #tpu.dot_dimension_numbers<[1], [0], [0], [1], [0, 0, 1, 1], [], []>} : vector<2x32xbf16>, vector<32x128xbf16>, vector<2x128xf32> -> vector<2x128xf32>
    %234 = vector.broadcast %5 : vector<1x128xf32> to vector<2x128xf32>
    %235 = arith.addf %234, %233 : vector<2x128xf32>
    %236 = arith.truncf %211 : vector<2x32xf32> to vector<2x32xbf16>
    %cst_39 = arith.constant dense<0.000000e+00> : vector<2x128xf32>
    %237 = tpu.matmul %236, %3, %cst_39 {dimension_numbers = #tpu.dot_dimension_numbers<[1], [0], [0], [1], [0, 0, 1, 1], [], []>} : vector<2x32xbf16>, vector<32x128xbf16>, vector<2x128xf32> -> vector<2x128xf32>
    %238 = arith.addf %235, %237 : vector<2x128xf32>
    %239 = vector.extract_strided_slice %238 {offsets = [0, 0], sizes = [2, 96], strides = [1, 1]} : vector<2x128xf32> to vector<2x96xf32>
    %240 = arith.negf %239 : vector<2x96xf32>
    %241 = math.exp %240 : vector<2x96xf32>
    %cst_40 = arith.constant 1.000000e+00 : f32
    %242 = vector.broadcast %cst_40 : f32 to vector<2x96xf32>
    %243 = arith.addf %242, %241 : vector<2x96xf32>
    %244 = arith.divf %242, %243 : vector<2x96xf32>
    %245 = vector.extract_strided_slice %238 {offsets = [0, 96], sizes = [2, 32], strides = [1, 1]} : vector<2x128xf32> to vector<2x32xf32>
    %246 = math.tanh %245 : vector<2x32xf32>
    %247 = vector.extract_strided_slice %244 {offsets = [0, 32], sizes = [2, 32], strides = [1, 1]} : vector<2x96xf32> to vector<2x32xf32>
    %248 = arith.mulf %247, %208 : vector<2x32xf32>
    %249 = vector.extract_strided_slice %244 {offsets = [0, 0], sizes = [2, 32], strides = [1, 1]} : vector<2x96xf32> to vector<2x32xf32>
    %250 = arith.mulf %249, %246 : vector<2x32xf32>
    %251 = arith.addf %248, %250 : vector<2x32xf32>
    %252 = vector.extract_strided_slice %244 {offsets = [0, 64], sizes = [2, 32], strides = [1, 1]} : vector<2x96xf32> to vector<2x32xf32>
    %253 = math.tanh %251 : vector<2x32xf32>
    %254 = arith.mulf %252, %253 : vector<2x32xf32>
    %255 = vector.extract_strided_slice %35 {offsets = [10, 0], sizes = [2, 128], strides = [1, 1]} : vector<16x128xf32> to vector<2x128xf32>
    %256 = arith.truncf %231 : vector<2x32xf32> to vector<2x32xbf16>
    %cst_41 = arith.constant dense<0.000000e+00> : vector<2x128xf32>
    %257 = tpu.matmul %256, %2, %cst_41 {dimension_numbers = #tpu.dot_dimension_numbers<[1], [0], [0], [1], [0, 0, 1, 1], [], []>} : vector<2x32xbf16>, vector<32x128xbf16>, vector<2x128xf32> -> vector<2x128xf32>
    %258 = arith.addf %255, %257 : vector<2x128xf32>
    %259 = vector.extract_strided_slice %258 {offsets = [0, 0], sizes = [2, 96], strides = [1, 1]} : vector<2x128xf32> to vector<2x96xf32>
    %260 = arith.negf %259 : vector<2x96xf32>
    %261 = math.exp %260 : vector<2x96xf32>
    %cst_42 = arith.constant 1.000000e+00 : f32
    %262 = vector.broadcast %cst_42 : f32 to vector<2x96xf32>
    %263 = arith.addf %262, %261 : vector<2x96xf32>
    %264 = arith.divf %262, %263 : vector<2x96xf32>
    %265 = vector.extract_strided_slice %258 {offsets = [0, 96], sizes = [2, 32], strides = [1, 1]} : vector<2x128xf32> to vector<2x32xf32>
    %266 = math.tanh %265 : vector<2x32xf32>
    %267 = vector.extract_strided_slice %264 {offsets = [0, 32], sizes = [2, 32], strides = [1, 1]} : vector<2x96xf32> to vector<2x32xf32>
    %268 = arith.mulf %267, %228 : vector<2x32xf32>
    %269 = vector.extract_strided_slice %264 {offsets = [0, 0], sizes = [2, 32], strides = [1, 1]} : vector<2x96xf32> to vector<2x32xf32>
    %270 = arith.mulf %269, %266 : vector<2x32xf32>
    %271 = arith.addf %268, %270 : vector<2x32xf32>
    %272 = vector.extract_strided_slice %264 {offsets = [0, 64], sizes = [2, 32], strides = [1, 1]} : vector<2x96xf32> to vector<2x32xf32>
    %273 = math.tanh %271 : vector<2x32xf32>
    %274 = arith.mulf %272, %273 : vector<2x32xf32>
    %275 = arith.truncf %274 : vector<2x32xf32> to vector<2x32xbf16>
    %cst_43 = arith.constant dense<0.000000e+00> : vector<2x128xf32>
    %276 = tpu.matmul %275, %4, %cst_43 {dimension_numbers = #tpu.dot_dimension_numbers<[1], [0], [0], [1], [0, 0, 1, 1], [], []>} : vector<2x32xbf16>, vector<32x128xbf16>, vector<2x128xf32> -> vector<2x128xf32>
    %277 = vector.broadcast %5 : vector<1x128xf32> to vector<2x128xf32>
    %278 = arith.addf %277, %276 : vector<2x128xf32>
    %279 = arith.truncf %254 : vector<2x32xf32> to vector<2x32xbf16>
    %cst_44 = arith.constant dense<0.000000e+00> : vector<2x128xf32>
    %280 = tpu.matmul %279, %3, %cst_44 {dimension_numbers = #tpu.dot_dimension_numbers<[1], [0], [0], [1], [0, 0, 1, 1], [], []>} : vector<2x32xbf16>, vector<32x128xbf16>, vector<2x128xf32> -> vector<2x128xf32>
    %281 = arith.addf %278, %280 : vector<2x128xf32>
    %282 = vector.extract_strided_slice %281 {offsets = [0, 0], sizes = [2, 96], strides = [1, 1]} : vector<2x128xf32> to vector<2x96xf32>
    %283 = arith.negf %282 : vector<2x96xf32>
    %284 = math.exp %283 : vector<2x96xf32>
    %cst_45 = arith.constant 1.000000e+00 : f32
    %285 = vector.broadcast %cst_45 : f32 to vector<2x96xf32>
    %286 = arith.addf %285, %284 : vector<2x96xf32>
    %287 = arith.divf %285, %286 : vector<2x96xf32>
    %288 = vector.extract_strided_slice %281 {offsets = [0, 96], sizes = [2, 32], strides = [1, 1]} : vector<2x128xf32> to vector<2x32xf32>
    %289 = math.tanh %288 : vector<2x32xf32>
    %290 = vector.extract_strided_slice %287 {offsets = [0, 32], sizes = [2, 32], strides = [1, 1]} : vector<2x96xf32> to vector<2x32xf32>
    %291 = arith.mulf %290, %251 : vector<2x32xf32>
    %292 = vector.extract_strided_slice %287 {offsets = [0, 0], sizes = [2, 32], strides = [1, 1]} : vector<2x96xf32> to vector<2x32xf32>
    %293 = arith.mulf %292, %289 : vector<2x32xf32>
    %294 = arith.addf %291, %293 : vector<2x32xf32>
    %295 = vector.extract_strided_slice %287 {offsets = [0, 64], sizes = [2, 32], strides = [1, 1]} : vector<2x96xf32> to vector<2x32xf32>
    %296 = math.tanh %294 : vector<2x32xf32>
    %297 = arith.mulf %295, %296 : vector<2x32xf32>
    %298 = vector.extract_strided_slice %35 {offsets = [12, 0], sizes = [2, 128], strides = [1, 1]} : vector<16x128xf32> to vector<2x128xf32>
    %299 = arith.truncf %274 : vector<2x32xf32> to vector<2x32xbf16>
    %cst_46 = arith.constant dense<0.000000e+00> : vector<2x128xf32>
    %300 = tpu.matmul %299, %2, %cst_46 {dimension_numbers = #tpu.dot_dimension_numbers<[1], [0], [0], [1], [0, 0, 1, 1], [], []>} : vector<2x32xbf16>, vector<32x128xbf16>, vector<2x128xf32> -> vector<2x128xf32>
    %301 = arith.addf %298, %300 : vector<2x128xf32>
    %302 = vector.extract_strided_slice %301 {offsets = [0, 0], sizes = [2, 96], strides = [1, 1]} : vector<2x128xf32> to vector<2x96xf32>
    %303 = arith.negf %302 : vector<2x96xf32>
    %304 = math.exp %303 : vector<2x96xf32>
    %cst_47 = arith.constant 1.000000e+00 : f32
    %305 = vector.broadcast %cst_47 : f32 to vector<2x96xf32>
    %306 = arith.addf %305, %304 : vector<2x96xf32>
    %307 = arith.divf %305, %306 : vector<2x96xf32>
    %308 = vector.extract_strided_slice %301 {offsets = [0, 96], sizes = [2, 32], strides = [1, 1]} : vector<2x128xf32> to vector<2x32xf32>
    %309 = math.tanh %308 : vector<2x32xf32>
    %310 = vector.extract_strided_slice %307 {offsets = [0, 32], sizes = [2, 32], strides = [1, 1]} : vector<2x96xf32> to vector<2x32xf32>
    %311 = arith.mulf %310, %271 : vector<2x32xf32>
    %312 = vector.extract_strided_slice %307 {offsets = [0, 0], sizes = [2, 32], strides = [1, 1]} : vector<2x96xf32> to vector<2x32xf32>
    %313 = arith.mulf %312, %309 : vector<2x32xf32>
    %314 = arith.addf %311, %313 : vector<2x32xf32>
    %315 = vector.extract_strided_slice %307 {offsets = [0, 64], sizes = [2, 32], strides = [1, 1]} : vector<2x96xf32> to vector<2x32xf32>
    %316 = math.tanh %314 : vector<2x32xf32>
    %317 = arith.mulf %315, %316 : vector<2x32xf32>
    %318 = arith.truncf %317 : vector<2x32xf32> to vector<2x32xbf16>
    %cst_48 = arith.constant dense<0.000000e+00> : vector<2x128xf32>
    %319 = tpu.matmul %318, %4, %cst_48 {dimension_numbers = #tpu.dot_dimension_numbers<[1], [0], [0], [1], [0, 0, 1, 1], [], []>} : vector<2x32xbf16>, vector<32x128xbf16>, vector<2x128xf32> -> vector<2x128xf32>
    %320 = vector.broadcast %5 : vector<1x128xf32> to vector<2x128xf32>
    %321 = arith.addf %320, %319 : vector<2x128xf32>
    %322 = arith.truncf %297 : vector<2x32xf32> to vector<2x32xbf16>
    %cst_49 = arith.constant dense<0.000000e+00> : vector<2x128xf32>
    %323 = tpu.matmul %322, %3, %cst_49 {dimension_numbers = #tpu.dot_dimension_numbers<[1], [0], [0], [1], [0, 0, 1, 1], [], []>} : vector<2x32xbf16>, vector<32x128xbf16>, vector<2x128xf32> -> vector<2x128xf32>
    %324 = arith.addf %321, %323 : vector<2x128xf32>
    %325 = vector.extract_strided_slice %324 {offsets = [0, 0], sizes = [2, 96], strides = [1, 1]} : vector<2x128xf32> to vector<2x96xf32>
    %326 = arith.negf %325 : vector<2x96xf32>
    %327 = math.exp %326 : vector<2x96xf32>
    %cst_50 = arith.constant 1.000000e+00 : f32
    %328 = vector.broadcast %cst_50 : f32 to vector<2x96xf32>
    %329 = arith.addf %328, %327 : vector<2x96xf32>
    %330 = arith.divf %328, %329 : vector<2x96xf32>
    %331 = vector.extract_strided_slice %324 {offsets = [0, 96], sizes = [2, 32], strides = [1, 1]} : vector<2x128xf32> to vector<2x32xf32>
    %332 = math.tanh %331 : vector<2x32xf32>
    %333 = vector.extract_strided_slice %330 {offsets = [0, 32], sizes = [2, 32], strides = [1, 1]} : vector<2x96xf32> to vector<2x32xf32>
    %334 = arith.mulf %333, %294 : vector<2x32xf32>
    %335 = vector.extract_strided_slice %330 {offsets = [0, 0], sizes = [2, 32], strides = [1, 1]} : vector<2x96xf32> to vector<2x32xf32>
    %336 = arith.mulf %335, %332 : vector<2x32xf32>
    %337 = arith.addf %334, %336 : vector<2x32xf32>
    %338 = vector.extract_strided_slice %330 {offsets = [0, 64], sizes = [2, 32], strides = [1, 1]} : vector<2x96xf32> to vector<2x32xf32>
    %339 = math.tanh %337 : vector<2x32xf32>
    %340 = arith.mulf %338, %339 : vector<2x32xf32>
    %341 = vector.extract_strided_slice %35 {offsets = [14, 0], sizes = [2, 128], strides = [1, 1]} : vector<16x128xf32> to vector<2x128xf32>
    %342 = arith.truncf %317 : vector<2x32xf32> to vector<2x32xbf16>
    %cst_51 = arith.constant dense<0.000000e+00> : vector<2x128xf32>
    %343 = tpu.matmul %342, %2, %cst_51 {dimension_numbers = #tpu.dot_dimension_numbers<[1], [0], [0], [1], [0, 0, 1, 1], [], []>} : vector<2x32xbf16>, vector<32x128xbf16>, vector<2x128xf32> -> vector<2x128xf32>
    %344 = arith.addf %341, %343 : vector<2x128xf32>
    %345 = vector.extract_strided_slice %344 {offsets = [0, 0], sizes = [2, 96], strides = [1, 1]} : vector<2x128xf32> to vector<2x96xf32>
    %346 = arith.negf %345 : vector<2x96xf32>
    %347 = math.exp %346 : vector<2x96xf32>
    %cst_52 = arith.constant 1.000000e+00 : f32
    %348 = vector.broadcast %cst_52 : f32 to vector<2x96xf32>
    %349 = arith.addf %348, %347 : vector<2x96xf32>
    %350 = arith.divf %348, %349 : vector<2x96xf32>
    %351 = vector.extract_strided_slice %344 {offsets = [0, 96], sizes = [2, 32], strides = [1, 1]} : vector<2x128xf32> to vector<2x32xf32>
    %352 = math.tanh %351 : vector<2x32xf32>
    %353 = vector.extract_strided_slice %350 {offsets = [0, 32], sizes = [2, 32], strides = [1, 1]} : vector<2x96xf32> to vector<2x32xf32>
    %354 = arith.mulf %353, %314 : vector<2x32xf32>
    %355 = vector.extract_strided_slice %350 {offsets = [0, 0], sizes = [2, 32], strides = [1, 1]} : vector<2x96xf32> to vector<2x32xf32>
    %356 = arith.mulf %355, %352 : vector<2x32xf32>
    %357 = arith.addf %354, %356 : vector<2x32xf32>
    %358 = vector.extract_strided_slice %350 {offsets = [0, 64], sizes = [2, 32], strides = [1, 1]} : vector<2x96xf32> to vector<2x32xf32>
    %359 = math.tanh %357 : vector<2x32xf32>
    %360 = arith.mulf %358, %359 : vector<2x32xf32>
    %361 = arith.truncf %360 : vector<2x32xf32> to vector<2x32xbf16>
    %cst_53 = arith.constant dense<0.000000e+00> : vector<2x128xf32>
    %362 = tpu.matmul %361, %4, %cst_53 {dimension_numbers = #tpu.dot_dimension_numbers<[1], [0], [0], [1], [0, 0, 1, 1], [], []>} : vector<2x32xbf16>, vector<32x128xbf16>, vector<2x128xf32> -> vector<2x128xf32>
    %363 = vector.broadcast %5 : vector<1x128xf32> to vector<2x128xf32>
    %364 = arith.addf %363, %362 : vector<2x128xf32>
    %365 = arith.truncf %340 : vector<2x32xf32> to vector<2x32xbf16>
    %cst_54 = arith.constant dense<0.000000e+00> : vector<2x128xf32>
    %366 = tpu.matmul %365, %3, %cst_54 {dimension_numbers = #tpu.dot_dimension_numbers<[1], [0], [0], [1], [0, 0, 1, 1], [], []>} : vector<2x32xbf16>, vector<32x128xbf16>, vector<2x128xf32> -> vector<2x128xf32>
    %367 = arith.addf %364, %366 : vector<2x128xf32>
    %368 = vector.extract_strided_slice %367 {offsets = [0, 0], sizes = [2, 96], strides = [1, 1]} : vector<2x128xf32> to vector<2x96xf32>
    %369 = arith.negf %368 : vector<2x96xf32>
    %370 = math.exp %369 : vector<2x96xf32>
    %cst_55 = arith.constant 1.000000e+00 : f32
    %371 = vector.broadcast %cst_55 : f32 to vector<2x96xf32>
    %372 = arith.addf %371, %370 : vector<2x96xf32>
    %373 = arith.divf %371, %372 : vector<2x96xf32>
    %374 = vector.extract_strided_slice %367 {offsets = [0, 96], sizes = [2, 32], strides = [1, 1]} : vector<2x128xf32> to vector<2x32xf32>
    %375 = math.tanh %374 : vector<2x32xf32>
    %376 = vector.extract_strided_slice %373 {offsets = [0, 32], sizes = [2, 32], strides = [1, 1]} : vector<2x96xf32> to vector<2x32xf32>
    %377 = arith.mulf %376, %337 : vector<2x32xf32>
    %378 = vector.extract_strided_slice %373 {offsets = [0, 0], sizes = [2, 32], strides = [1, 1]} : vector<2x96xf32> to vector<2x32xf32>
    %379 = arith.mulf %378, %375 : vector<2x32xf32>
    %380 = arith.addf %377, %379 : vector<2x32xf32>
    %381 = vector.extract_strided_slice %373 {offsets = [0, 64], sizes = [2, 32], strides = [1, 1]} : vector<2x96xf32> to vector<2x32xf32>
    %382 = math.tanh %380 : vector<2x32xf32>
    %383 = arith.mulf %381, %382 : vector<2x32xf32>
    %384 = arith.truncf %383 : vector<2x32xf32> to vector<2x32xbf16>
    %c0_56 = arith.constant 0 : index
    %c0_57 = arith.constant 0 : index
    %385 = vector.load %arg7[%c0_56, %c0_57] : memref<32x8xbf16, #tpu.memory_space<vmem>>, vector<32x8xbf16>
    %cst_58 = arith.constant dense<0.000000e+00> : vector<2x8xf32>
    %386 = tpu.matmul %384, %385, %cst_58 {dimension_numbers = #tpu.dot_dimension_numbers<[1], [0], [0], [1], [0, 0, 1, 1], [], []>} : vector<2x32xbf16>, vector<32x8xbf16>, vector<2x8xf32> -> vector<2x8xf32>
    %c0_59 = arith.constant 0 : index
    %c0_60 = arith.constant 0 : index
    %387 = vector.load %arg8[%c0_59, %c0_60] : memref<1x8xf32, #tpu.memory_space<vmem>>, vector<1x8xf32>
    %388 = vector.broadcast %387 : vector<1x8xf32> to vector<2x8xf32>
    %389 = arith.addf %386, %388 : vector<2x8xf32>
    %c0_61 = arith.constant 0 : index
    %c0_62 = arith.constant 0 : index
    %390 = vector.load %arg9[%c0_61, %c0_62] : memref<2x8xf32, #tpu.memory_space<vmem>>, vector<2x8xf32>
    tpu.vector_store %arg9[%c0_61, %c0_62], %389 {strides = array<i32>} : memref<2x8xf32, #tpu.memory_space<vmem>>, vector<2x8xf32>,
    return
  }
}

</mosaic_0001>

<bundles_post_ra>
// kernel: model_forward.1
= control target key start
LH: loop header
LB: loop body
LE: loop exit
PB: predicated region body
PF: predicated region fallthrough
CT: control target
= control target key end

     0   :  { %v2320_v1 = vmov 0.0   ;;  %vm2321_vm0 = vmmov 0   ;;  %v2322_v4 = vmov 0   ;;  %v2323_v5 = vmov 2   ;;  %s2792_s0 = inlined_call_operand.vmem [shape: f32[16,4], index: 0, kind: input, shape index: {}]   ;;  %s2793_s1 = inlined_call_operand.vmem [shape: bf16[4,128], index: 1, kind: input, shape index: {}]   ;;  %s2794_s2 = inlined_call_operand.vmem [shape: bf16[32,128], index: 2, kind: input, shape index: {}]   ;;  %s2795_s3 = inlined_call_operand.vmem [shape: f32[1,128], index: 3, kind: input, shape index: {}]   ;;  %s2796_s4 = inlined_call_operand.vmem [shape: bf16[32,128], index: 4, kind: input, shape index: {}]   ;;  %s2797_s5 = inlined_call_operand.vmem [shape: bf16[32,128], index: 5, kind: input, shape index: {}]   ;;  %s2798_s6 = inlined_call_operand.vmem [shape: f32[1,128], index: 6, kind: input, shape index: {}]   ;;  %s2799_s7 = inlined_call_operand.vmem [shape: bf16[32,8], index: 7, kind: input, shape index: {}]   ;;  %s2800_s8 = inlined_call_operand.vmem [shape: f32[1,8], index: 8, kind: input, shape index: {}]   ;;  %s2801_s9 = inlined_call_operand.hbm [shape: f32[2,8], index: 9, kind: output, shape index: {}]  }
   0x1   :  { %v2382_v0 = vld [vmem:[%s2794_s2] sm:$0xff]   ;;  %1899 = vmatprep.subr.bf16.mxu0 %v2320_v1  ;;  %1907 = vmatprep.subr.bf16.mxu1 %v2320_v1  ;;  %v2390_v2 = vld [vmem:[%s2794_s2 + $0x8] sm:$0xff]   ;;  %v2324_v6 = vmov 1  }
   0x2   :  { %1900 = vmatpush3.bf16.msra.mxu0 %v2382_v0  ;;  %1903 = vmatprep.mubr.msk.bf16.mxu0 %vm2321_vm0, %v2320_v1  ;;  %v49_v3 = vld [vmem:[%s2792_s0] sm:$0xff] }
   0x3   :  { %1901 = vmatprep.subr.bf16.mxu0 %v2320_v1  ;;  %2148 = vset.pattern.permute.xlu0 %v2322_v4 }
   0x4   :  { %54 = vperm.xlu0 %2148, %v49_v3   ;;  %2150 = vset.pattern.permute.xlu1 %v2323_v5 }
   0x5   :  { %93 = vperm.xlu1 %2150, %v49_v3   ;;  %1911 = vmatprep.mubr.msk.bf16.mxu1 %vm2321_vm0, %v2320_v1 }
   0x6   :  { %1902 = vmatpush3.bf16.msra.mxu0 %v2390_v2 }
   0x7   :  { %1923 = vmatprep.subr.bf16.mxu0 %v2320_v1 }
   0x8   :  { %2149 = vset.pattern.permute.xlu0 %v2324_v6 }
   0x9   :  { %14 = vsyncpa [#allocation3], 0  ;;  %1904 = vmatmul.mubr.bf16.vlgmr.msra.gmra.mrb[0].mxu0 %v2322_v4  ;;  %77 = vperm.xlu0 %2149, %v49_v3   ;;  %v2325_v7 = vmov 3   ;;  %v62_v8 = vlaneseq  ;;  %v34_v10 = vld [vmem:[%s2793_s1] sm:$0x3]  ;;  %s2326_s1 = smov 32  }
   0xa   :  { %2151 = vset.pattern.permute.xlu1 %v2325_v7  ;;  %1924 = vmatpush3.bf16.msra.mxu0 %v2382_v0  ;;  %v51_v12 = vunpack.c.l.bf16 %v34_v10  ;;  %v2424_v19 = vld [vmem:[%s2795_s3] ss:$0 sm:$0xff]  ;;  %v2451_v49 = vld [vmem:[%s2796_s4 + $0x8] sm:$0xff]   ;;  %s2327_s22 = smov 64   ;;  %vm136_vm1 = vcmask 261120   ;;  %s2328_s20 = smov [#allocation2]  }
   0xb   :  { %109 = vperm.xlu1 %2151, %v49_v3   ;;  %1925 = vmatprep.subr.bf16.mxu0 %v2320_v1  ;;  %v63_v9 = vshrl.u32 %v62_v8, 7  ;;  %v2445_v48 = vld [vmem:[%s2796_s4] sm:$0xff]   ;;  %v2469_v56 = vld [vmem:[%s2797_s5 + $0x8] sm:$0xff]   ;;  %vm1758_vm2 = vcmask 58368  }
   0xc   :  { %1927 = vmatprep.mubr.msk.bf16.mxu0 %vm2321_vm0, %v2320_v1  ;;  %1908 = vmatpush3.bf16.msra.mxu1 %v2445_v48  ;;  %v2461_v54 = vld [vmem:[%s2797_s5] sm:$0xff]  }
   0xd   :  { %v64_v11 = vsub.s32 0, %v63_v9  ;;  %v86_v15 = vsub.s32 1, %v63_v9  ;;  %v102_v17 = vsub.s32 2, %v63_v9  ;;  %v118_v25 = vsub.s32 3, %v63_v9  ;;  %1909 = vmatprep.subr.bf16.mxu1 %v2320_v1  ;;  %v2493_v63 = vld [vmem:[%s2798_s6] ss:$0 sm:$0xff] }
   0xe   :  { %1926 = vmatpush3.bf16.msra.mxu0 %v2390_v2 }
   0xf   :  { %1931 = vmatprep.subr.bf16.mxu0 %v2320_v1  ;;  %2152 = vset.pattern.permute.xlu1 %v2322_v4  ;;  %v2416_v14 = vrot.slane %v51_v12, %v64_v11  ;;  %v2419_v18 = vrot.slane %v51_v12, %v86_v15  ;;  %v2427_v23 = vrot.slane %v51_v12, %v102_v17 }
  0x10   :  { %v2431_v28 = vrot.slane %v51_v12, %v118_v25  ;;  %1910 = vmatpush3.bf16.msra.mxu1 %v2451_v49 }
  0x11   :  { %1915 = vmatprep.subr.bf16.mxu1 %v2320_v1 }
  0x83   :  { %v55_v13 = vpop.permute.xlu0 %54 }
  0x84   :  { %v66_v16 = vmul.f32 %v2416_v14, %v55_v13  ;;  %v94_v21 = vpop.permute.xlu1 %93 }
  0x85   :  { %v104_v26 = vmul.f32 %v2427_v23, %v94_v21 }
  0x86   :  { %v74_v22 = vadd.f32 %v2424_v19, %v66_v16 }
  0x88   :  { %v78_v20 = vpop.permute.xlu0 %77 }
  0x89   :  { %v88_v24 = vmul.f32 %v2419_v18, %v78_v20 }
  0x8a   :  { %v110_v29 = vpop.permute.xlu1 %109 }
  0x8b   :  { %v90_v27 = vadd.f32 %v88_v24, %v74_v22  ;;  %v120_v31 = vmul.f32 %v2431_v28, %v110_v29 }
  0x8d   :  { %v106_v30 = vadd.f32 %v104_v26, %v90_v27 }
  0x8f   :  { %v2434_v32 = vadd.f32 %v120_v31, %v106_v30 }
  0xdc   :  { %v174_v33 = vpop.f32.mrb[0].mxu0 }
  0xdd   :  { %v180_v34 = vadd.f32 %v174_v33, %v2434_v32  ;;  %v1905_v35 = vpop.f32.mrb[1].mxu0 }
  0xde   :  { %v177_v36 = vpop.f32.mrb[2].mxu0 }
  0xdf   :  { %2163 = vtanh.f32 %v180_v34  ;;  %v1906_v37 = vpop.f32.mrb[3].mxu0  ;;  %v1777_v39 = vmul.f32 -1.442695, %v180_v34 }
  0xe1   :  { %2165 = vpow2.f32 %v1777_v39 }
  0xe9   :  { %v2164_v38 = vpop.eup %2163 }
  0xea   :  { %190 = vrot.lane.b32.xlu1 %v2164_v38, %s2326_s1 }
  0xeb   :  { %v2166_v40 = vpop.eup %2165 }
  0xec   :  { %v184_v41 = vadd.f32 1.0, %v2166_v40 }
  0xee   :  { %2167 = vrcp.f32 %v184_v41 }
  0xf8   :  { %v2168_v42 = vpop.eup %2167 }
  0xf9   :  { %v188_v45 = vmul.f32 0.0, %v2168_v42 }
 0x15c   :  { %v191_v43 = vpop.permute.xlu1 %190 }
 0x15d   :  { %v193_v44 = vmul.f32 %v2168_v42, %v191_v43 }
 0x15f   :  { %195 = vrot.lane.b32.xlu0 %v193_v44, %s2326_s1 }
 0x1d1   :  { %v196_v46 = vpop.permute.xlu0 %195 }
 0x1d2   :  { %v2439_v47 = vadd.f32 %v196_v46, %v188_v45 }
 0x1d4   :  { %2169 = vtanh.f32 %v2439_v47  ;;  %v400_v29 = vrot.slane %v2439_v47, 6 }
 0x1de   :  { %v2170_v50 = vpop.eup %2169 }
 0x1df   :  { %201 = vrot.lane.b32.xlu1 %v2170_v50, %s2326_s1 }
 0x251   :  { %v202_v51 = vpop.permute.xlu1 %201 }
 0x252   :  { %v204_v52 = vmul.f32 %v2168_v42, %v202_v51 }
 0x254   :  { %v205_v53 = vpack.c.bf16 %v204_v52, %v204_v52 }
 0x256   :  { %207 = vrot.lane.b32.xlu0 %v205_v53, %s2327_s22 }
 0x2c8   :  { %v208_v55 = vpop.permute.xlu0 %207 }
 0x2c9   :  { %1912 = vmatmul.mubr.msk.bf16.vlgmr.msra.gmra.mrb[0].mxu1 %vm136_vm1, %v208_v55  ;;  %1928 = vmatmul.mubr.msk.bf16.vlgmr.msra.gmra.mrb[4].mxu0 %vm136_vm1, %v208_v55 }
 0x2ca   :  { %1916 = vmatpush3.bf16.msra.mxu1 %v2461_v54  ;;  %1919 = vmatprep.mubr.msk.bf16.mxu1 %vm2321_vm0, %v2320_v1 }
 0x2cb   :  { %1917 = vmatprep.subr.bf16.mxu1 %v2320_v1  ;;  %1932 = vmatpush3.bf16.msra.mxu0 %v2445_v48 }
 0x2cc   :  { %1933 = vmatprep.subr.bf16.mxu0 %v2320_v1  ;;  %1935 = vmatprep.mubr.msk.bf16.mxu0 %vm2321_vm0, %v2320_v1 }
 0x2ce   :  { %1918 = vmatpush3.bf16.msra.mxu1 %v2469_v56 }
 0x2cf   :  { %1947 = vmatprep.subr.bf16.mxu1 %v2320_v1  ;;  %1934 = vmatpush3.bf16.msra.mxu0 %v2451_v49 }
 0x2d0   :  { %1939 = vmatprep.subr.bf16.mxu0 %v2320_v1 }
 0x2d5   :  { %1920 = vmatmul.mubr.bf16.vlgmr.msra.gmra.mrb[0].mxu1 %v2322_v4 }
 0x2d6   :  { %1948 = vmatpush3.bf16.msra.mxu1 %v2382_v0  ;;  %1951 = vmatprep.mubr.msk.bf16.mxu1 %vm2321_vm0, %v2320_v1 }
 0x2d7   :  { %1949 = vmatprep.subr.bf16.mxu1 %v2320_v1 }
 0x2da   :  { %1950 = vmatpush3.bf16.msra.mxu1 %v2390_v2 }
 0x2db   :  { %1955 = vmatprep.subr.bf16.mxu1 %v2320_v1 }
 0x39c   :  { %v382_v57 = vpop.f32.mrb[4].mxu0 }
 0x39d   :  { %v389_v58 = vrot.slane %v382_v57, 6  ;;  %v1929_v59 = vpop.f32.mrb[5].mxu0 }
 0x39e   :  { %v385_v60 = vpop.f32.mrb[6].mxu0 }
 0x39f   :  { %v391_v61 = vadd.f32 %v389_v58, %v2434_v32  ;;  %v1930_v62 = vpop.f32.mrb[7].mxu0 }
 0x3a1   :  { %2171 = vtanh.f32 %v391_v61  ;;  %v1786_v12 = vmul.f32 -1.442695, %v391_v61 }
 0x3a8   :  { %v317_v3 = vpop.f32.mrb[0].mxu1 }
 0x3a9   :  { %v2099_v4 = vadd.f32 %v2493_v63, %v317_v3  ;;  %v1921_v6 = vpop.f32.mrb[1].mxu1 }
 0x3aa   :  { %v320_v8 = vpop.f32.mrb[2].mxu1 }
 0x3ab   :  { %v2172_v9 = vpop.eup %2171  ;;  %2173 = vtanh.f32 %v2099_v4  ;;  %v1922_v10 = vpop.f32.mrb[3].mxu1  ;;  %v1784_v13 = vmul.f32 -1.442695, %v2099_v4 }
 0x3ac   :  { %404 = vrot.lane.b32.xlu1 %v2172_v9, %s2326_s1  ;;  %2175 = vpow2.f32 %v1786_v12 }
 0x3ad   :  { %2177 = vpow2.f32 %v1784_v13 }
 0x3b5   :  { %v2174_v11 = vpop.eup %2173 }
 0x3b6   :  { %333 = vrot.lane.b32.xlu0 %v2174_v11, %s2326_s1  ;;  %v2176_v15 = vpop.eup %2175 }
 0x3b7   :  { %v395_v16 = vadd.f32 1.0, %v2176_v15  ;;  %v2178_v17 = vpop.eup %2177 }
 0x3b8   :  { %v327_v20 = vadd.f32 1.0, %v2178_v17 }
 0x3b9   :  { %2179 = vrcp.f32 %v395_v16 }
 0x3ba   :  { %2181 = vrcp.f32 %v327_v20 }
 0x3c3   :  { %v2180_v21 = vpop.eup %2179 }
 0x3c4   :  { %v2182_v25 = vpop.eup %2181  ;;  %v402_v30 = vmul.f32 %v2180_v21, %v400_v29 }
 0x3c5   :  { %v331_v34 = vmul.f32 0.0, %v2182_v25 }
 0x41e   :  { %v405_v22 = vpop.permute.xlu1 %404 }
 0x41f   :  { %v407_v24 = vmul.f32 %v2180_v21, %v405_v22 }
 0x421   :  { %409 = vrot.lane.b32.xlu1 %v407_v24, %s2326_s1 }
 0x428   :  { %v334_v26 = vpop.permute.xlu0 %333 }
 0x429   :  { %v336_v27 = vmul.f32 %v2182_v25, %v334_v26 }
 0x42b   :  { %338 = vrot.lane.b32.xlu0 %v336_v27, %s2326_s1 }
 0x493   :  { %v410_v31 = vpop.permute.xlu1 %409 }
 0x494   :  { %v2501_v33 = vadd.f32 %v410_v31, %v402_v30 }
 0x496   :  { %2183 = vtanh.f32 %v2501_v33  ;;  %v592_v22 = vrot.slane %v2501_v33, 6 }
 0x49d   :  { %v339_v35 = vpop.permute.xlu0 %338 }
 0x49e   :  { %v2504_v36 = vadd.f32 %v339_v35, %v331_v34 }
 0x4a0   :  { %v2184_v37 = vpop.eup %2183  ;;  %2185 = vtanh.f32 %v2504_v36 }
 0x4a1   :  { %415 = vrot.lane.b32.xlu1 %v2184_v37, %s2326_s1 }
 0x4aa   :  { %v2186_v38 = vpop.eup %2185 }
 0x4ab   :  { %344 = vrot.lane.b32.xlu0 %v2186_v38, %s2326_s1 }
 0x513   :  { %v416_v39 = vpop.permute.xlu1 %415 }
 0x514   :  { %v418_v40 = vmul.f32 %v2180_v21, %v416_v39 }
 0x516   :  { %v419_v41 = vpack.c.bf16 %v418_v40, %v418_v40 }
 0x518   :  { %v421_v42 = vrot.slane %v419_v41, 1 }
 0x51a   :  { %422 = vrot.lane.b32.xlu1 %v421_v42, %s2327_s22 }
 0x51d   :  { %v345_v43 = vpop.permute.xlu0 %344 }
 0x51e   :  { %v347_v44 = vmul.f32 %v2182_v25, %v345_v43 }
 0x520   :  { %v468_v45 = vpack.c.bf16 %v347_v44, %v347_v44 }
 0x522   :  { %470 = vrot.lane.b32.xlu0 %v468_v45, %s2327_s22 }
 0x58c   :  { %v423_v46 = vpop.permute.xlu1 %422 }
 0x58d   :  { %1936 = vmatmul.mubr.msk.bf16.vlgmr.msra.gmra.mrb[8].mxu0 %vm136_vm1, %v423_v46  ;;  %1952 = vmatmul.mubr.msk.bf16.vlgmr.msra.gmra.mrb[4].mxu1 %vm136_vm1, %v423_v46 }
 0x58e   :  { %1940 = vmatpush3.bf16.msra.mxu0 %v2461_v54  ;;  %1943 = vmatprep.mubr.msk.bf16.mxu0 %vm2321_vm0, %v2320_v1 }
 0x58f   :  { %1941 = vmatprep.subr.bf16.mxu0 %v2320_v1  ;;  %1956 = vmatpush3.bf16.msra.mxu1 %v2445_v48 }
 0x590   :  { %1957 = vmatprep.subr.bf16.mxu1 %v2320_v1  ;;  %1959 = vmatprep.mubr.msk.bf16.mxu1 %vm2321_vm0, %v2320_v1 }
 0x592   :  { %1942 = vmatpush3.bf16.msra.mxu0 %v2469_v56 }
 0x593   :  { %1971 = vmatprep.subr.bf16.mxu0 %v2320_v1  ;;  %1958 = vmatpush3.bf16.msra.mxu1 %v2451_v49 }
 0x594   :  { %1963 = vmatprep.subr.bf16.mxu1 %v2320_v1  ;;  %v471_v47 = vpop.permute.xlu0 %470 }
 0x599   :  { %1944 = vmatmul.mubr.msk.bf16.vlgmr.msra.gmra.mrb[8].mxu0 %vm136_vm1, %v471_v47 }
 0x59a   :  { %1972 = vmatpush3.bf16.msra.mxu0 %v2382_v0  ;;  %1975 = vmatprep.mubr.msk.bf16.mxu0 %vm2321_vm0, %v2320_v1 }
 0x59b   :  { %1973 = vmatprep.subr.bf16.mxu0 %v2320_v1 }
 0x59e   :  { %1974 = vmatpush3.bf16.msra.mxu0 %v2390_v2 }
 0x59f   :  { %1979 = vmatprep.subr.bf16.mxu0 %v2320_v1 }
 0x660   :  { %v574_v50 = vpop.f32.mrb[4].mxu1 }
 0x661   :  { %v581_v51 = vrot.slane %v574_v50, 4  ;;  %v1953_v52 = vpop.f32.mrb[5].mxu1 }
 0x662   :  { %v577_v53 = vpop.f32.mrb[6].mxu1 }
 0x663   :  { %v583_v55 = vadd.f32 %v581_v51, %v2434_v32  ;;  %v1954_v57 = vpop.f32.mrb[7].mxu1 }
 0x665   :  { %2187 = vtanh.f32 %v583_v55  ;;  %v1791_v6 = vmul.f32 -1.442695, %v583_v55 }
 0x66c   :  { %v509_v58 = vpop.f32.mrb[8].mxu0 }
 0x66d   :  { %v2100_v59 = vadd.f32 %v2493_v63, %v509_v58  ;;  %v1945_v60 = vpop.f32.mrb[9].mxu0 }
 0x66e   :  { %v512_v61 = vpop.f32.mrb[10].mxu0 }
 0x66f   :  { %v2188_v62 = vpop.eup %2187  ;;  %2189 = vtanh.f32 %v2100_v59  ;;  %v1946_v3 = vpop.f32.mrb[11].mxu0  ;;  %v1789_v8 = vmul.f32 -1.442695, %v2100_v59 }
 0x670   :  { %596 = vrot.lane.b32.xlu1 %v2188_v62, %s2326_s1  ;;  %2191 = vpow2.f32 %v1791_v6 }
 0x671   :  { %2193 = vpow2.f32 %v1789_v8 }
 0x679   :  { %v2190_v4 = vpop.eup %2189 }
 0x67a   :  { %525 = vrot.lane.b32.xlu0 %v2190_v4, %s2326_s1  ;;  %v2192_v9 = vpop.eup %2191 }
 0x67b   :  { %v587_v10 = vadd.f32 1.0, %v2192_v9  ;;  %v2194_v11 = vpop.eup %2193 }
 0x67c   :  { %v519_v12 = vadd.f32 1.0, %v2194_v11 }
 0x67d   :  { %2195 = vrcp.f32 %v587_v10 }
 0x67e   :  { %2197 = vrcp.f32 %v519_v12 }
 0x687   :  { %v2196_v13 = vpop.eup %2195 }
 0x688   :  { %v2198_v17 = vpop.eup %2197  ;;  %v594_v24 = vmul.f32 %v2196_v13, %v592_v22 }
 0x689   :  { %v523_v27 = vmul.f32 %v2198_v17, %v2504_v36 }
 0x6e2   :  { %v597_v15 = vpop.permute.xlu1 %596 }
 0x6e3   :  { %v599_v16 = vmul.f32 %v2196_v13, %v597_v15 }
 0x6e5   :  { %601 = vrot.lane.b32.xlu1 %v599_v16, %s2326_s1 }
 0x6ec   :  { %v526_v20 = vpop.permute.xlu0 %525 }
 0x6ed   :  { %v528_v21 = vmul.f32 %v2198_v17, %v526_v20 }
 0x6ef   :  { %530 = vrot.lane.b32.xlu0 %v528_v21, %s2326_s1 }
 0x757   :  { %v602_v25 = vpop.permute.xlu1 %601 }
 0x758   :  { %v2539_v26 = vadd.f32 %v602_v25, %v594_v24 }
 0x75a   :  { %2199 = vtanh.f32 %v2539_v26 }
 0x761   :  { %v531_v29 = vpop.permute.xlu0 %530 }
 0x762   :  { %v2543_v30 = vadd.f32 %v531_v29, %v523_v27 }
 0x764   :  { %v2200_v31 = vpop.eup %2199  ;;  %2201 = vtanh.f32 %v2543_v30 }
 0x765   :  { %607 = vrot.lane.b32.xlu1 %v2200_v31, %s2326_s1 }
 0x76e   :  { %v2202_v34 = vpop.eup %2201 }
 0x76f   :  { %536 = vrot.lane.b32.xlu0 %v2202_v34, %s2326_s1 }
 0x7d7   :  { %v608_v33 = vpop.permute.xlu1 %607 }
 0x7d8   :  { %v610_v35 = vmul.f32 %v2196_v13, %v608_v33  ;;  %v784_v13 = vrot.slane %v2539_v26, 6 }
 0x7da   :  { %v611_v37 = vpack.c.bf16 %v610_v35, %v610_v35 }
 0x7dc   :  { %v613_v38 = vrot.slane %v611_v37, 2 }
 0x7de   :  { %614 = vrot.lane.b32.xlu1 %v613_v38, %s2327_s22 }
 0x7e1   :  { %v537_v39 = vpop.permute.xlu0 %536 }
 0x7e2   :  { %v539_v40 = vmul.f32 %v2198_v17, %v537_v39 }
 0x7e4   :  { %v660_v36 = vpack.c.bf16 %v539_v40, %v539_v40 }
 0x7e6   :  { %662 = vrot.lane.b32.xlu0 %v660_v36, %s2327_s22 }
 0x850   :  { %v615_v41 = vpop.permute.xlu1 %614 }
 0x851   :  { %1960 = vmatmul.mubr.msk.bf16.vlgmr.msra.gmra.mrb[8].mxu1 %vm136_vm1, %v615_v41  ;;  %1976 = vmatmul.mubr.msk.bf16.vlgmr.msra.gmra.mrb[12].mxu0 %vm136_vm1, %v615_v41 }
 0x852   :  { %1964 = vmatpush3.bf16.msra.mxu1 %v2461_v54  ;;  %1967 = vmatprep.mubr.msk.bf16.mxu1 %vm2321_vm0, %v2320_v1 }
 0x853   :  { %1965 = vmatprep.subr.bf16.mxu1 %v2320_v1  ;;  %1980 = vmatpush3.bf16.msra.mxu0 %v2445_v48 }
 0x854   :  { %1981 = vmatprep.subr.bf16.mxu0 %v2320_v1  ;;  %1983 = vmatprep.mubr.msk.bf16.mxu0 %vm2321_vm0, %v2320_v1 }
 0x856   :  { %1966 = vmatpush3.bf16.msra.mxu1 %v2469_v56 }
 0x857   :  { %1995 = vmatprep.subr.bf16.mxu1 %v2320_v1  ;;  %1982 = vmatpush3.bf16.msra.mxu0 %v2451_v49 }
 0x858   :  { %1987 = vmatprep.subr.bf16.mxu0 %v2320_v1  ;;  %v663_v42 = vpop.permute.xlu0 %662 }
 0x85d   :  { %1968 = vmatmul.mubr.msk.bf16.vlgmr.msra.gmra.mrb[8].mxu1 %vm136_vm1, %v663_v42 }
 0x85e   :  { %1996 = vmatpush3.bf16.msra.mxu1 %v2382_v0  ;;  %1999 = vmatprep.mubr.msk.bf16.mxu1 %vm2321_vm0, %v2320_v1 }
 0x85f   :  { %1997 = vmatprep.subr.bf16.mxu1 %v2320_v1 }
 0x862   :  { %1998 = vmatpush3.bf16.msra.mxu1 %v2390_v2 }
 0x863   :  { %2003 = vmatprep.subr.bf16.mxu1 %v2320_v1 }
 0x924   :  { %v766_v43 = vpop.f32.mrb[12].mxu0 }
 0x925   :  { %v773_v44 = vrot.slane %v766_v43, 2  ;;  %v1977_v45 = vpop.f32.mrb[13].mxu0 }
 0x926   :  { %v769_v46 = vpop.f32.mrb[14].mxu0 }
 0x927   :  { %v775_v47 = vadd.f32 %v773_v44, %v2434_v32  ;;  %v1978_v50 = vpop.f32.mrb[15].mxu0 }
 0x929   :  { %2203 = vtanh.f32 %v775_v47  ;;  %v1796_v60 = vmul.f32 -1.442695, %v775_v47 }
 0x930   :  { %v701_v51 = vpop.f32.mrb[8].mxu1 }
 0x931   :  { %v2101_v52 = vadd.f32 %v2493_v63, %v701_v51  ;;  %v1969_v53 = vpop.f32.mrb[9].mxu1 }
 0x932   :  { %v704_v55 = vpop.f32.mrb[10].mxu1 }
 0x933   :  { %v2204_v57 = vpop.eup %2203  ;;  %2205 = vtanh.f32 %v2101_v52  ;;  %v1970_v58 = vpop.f32.mrb[11].mxu1  ;;  %v1794_v61 = vmul.f32 -1.442695, %v2101_v52 }
 0x934   :  { %788 = vrot.lane.b32.xlu1 %v2204_v57, %s2326_s1  ;;  %2207 = vpow2.f32 %v1796_v60 }
 0x935   :  { %2209 = vpow2.f32 %v1794_v61 }
 0x93d   :  { %v2206_v59 = vpop.eup %2205 }
 0x93e   :  { %717 = vrot.lane.b32.xlu0 %v2206_v59, %s2326_s1  ;;  %v2208_v62 = vpop.eup %2207 }
 0x93f   :  { %v779_v32 = vadd.f32 1.0, %v2208_v62  ;;  %v2210_v3 = vpop.eup %2209 }
 0x940   :  { %v711_v4 = vadd.f32 1.0, %v2210_v3 }
 0x941   :  { %2211 = vrcp.f32 %v779_v32 }
 0x942   :  { %2213 = vrcp.f32 %v711_v4 }
 0x94b   :  { %v2212_v6 = vpop.eup %2211 }
 0x94c   :  { %v2214_v10 = vpop.eup %2213  ;;  %v786_v15 = vmul.f32 %v2212_v6, %v784_v13 }
 0x94d   :  { %v715_v20 = vmul.f32 %v2214_v10, %v2543_v30  ;;  %v50_v30 = vld [vmem:[%s2792_s0 + $0x8] sm:$0xff] }
 0x9a6   :  { %v789_v8 = vpop.permute.xlu1 %788 }
 0x9a7   :  { %v791_v9 = vmul.f32 %v2212_v6, %v789_v8 }
 0x9a9   :  { %793 = vrot.lane.b32.xlu1 %v791_v9, %s2326_s1 }
 0x9b0   :  { %v718_v11 = vpop.permute.xlu0 %717 }
 0x9b1   :  { %v720_v12 = vmul.f32 %v2214_v10, %v718_v11 }
 0x9b3   :  { %722 = vrot.lane.b32.xlu0 %v720_v12, %s2326_s1 }
 0xa1b   :  { %v794_v16 = vpop.permute.xlu1 %793 }
 0xa1c   :  { %v2578_v17 = vadd.f32 %v794_v16, %v786_v15 }
 0xa1e   :  { %2215 = vtanh.f32 %v2578_v17  ;;  %v973_v12 = vrot.slane %v2578_v17, 6 }
 0xa25   :  { %v723_v21 = vpop.permute.xlu0 %722 }
 0xa26   :  { %v2582_v22 = vadd.f32 %v723_v21, %v715_v20 }
 0xa28   :  { %v2216_v24 = vpop.eup %2215  ;;  %2217 = vtanh.f32 %v2582_v22 }
 0xa29   :  { %799 = vrot.lane.b32.xlu1 %v2216_v24, %s2326_s1 }
 0xa32   :  { %v2218_v25 = vpop.eup %2217 }
 0xa33   :  { %728 = vrot.lane.b32.xlu0 %v2218_v25, %s2326_s1 }
 0xa9b   :  { %v800_v26 = vpop.permute.xlu1 %799 }
 0xa9c   :  { %v802_v27 = vmul.f32 %v2212_v6, %v800_v26 }
 0xa9e   :  { %v803_v29 = vpack.c.bf16 %v802_v27, %v802_v27 }
 0xaa0   :  { %v805_v31 = vrot.slane %v803_v29, 3 }
 0xaa2   :  { %806 = vrot.lane.b32.xlu1 %v805_v31, %s2327_s22 }
 0xaa5   :  { %v729_v34 = vpop.permute.xlu0 %728 }
 0xaa6   :  { %v731_v33 = vmul.f32 %v2214_v10, %v729_v34  ;;  %59 = vperm.xlu1 %2152, %v50_v30  }
 0xaa8   :  { %v852_v35 = vpack.c.bf16 %v731_v33, %v731_v33 }
 0xaaa   :  { %854 = vrot.lane.b32.xlu0 %v852_v35, %s2327_s22  ;;  %2153 = vset.pattern.permute.xlu1 %v2323_v5 }
 0xaab   :  { %97 = vperm.xlu1 %2153, %v50_v30  }
 0xaae   :  { %81 = vperm.xlu0 %2149, %v50_v30  }
 0xab2   :  { %2154 = vset.pattern.permute.xlu0 %v2325_v7 }
 0xab3   :  { %113 = vperm.xlu0 %2154, %v50_v30  }
 0xb14   :  { %v807_v37 = vpop.permute.xlu1 %806 }
 0xb15   :  { %1984 = vmatmul.mubr.msk.bf16.vlgmr.msra.gmra.mrb[16].mxu0 %vm136_vm1, %v807_v37  ;;  %2000 = vmatmul.mubr.msk.bf16.vlgmr.msra.gmra.mrb[12].mxu1 %vm136_vm1, %v807_v37 }
 0xb16   :  { %1988 = vmatpush3.bf16.msra.mxu0 %v2461_v54  ;;  %1991 = vmatprep.mubr.msk.bf16.mxu0 %vm2321_vm0, %v2320_v1 }
 0xb17   :  { %1989 = vmatprep.subr.bf16.mxu0 %v2320_v1  ;;  %2004 = vmatpush3.bf16.msra.mxu1 %v2445_v48 }
 0xb18   :  { %2005 = vmatprep.subr.bf16.mxu1 %v2320_v1  ;;  %2007 = vmatprep.mubr.msk.bf16.mxu1 %vm2321_vm0, %v2320_v1 }
 0xb1a   :  { %1990 = vmatpush3.bf16.msra.mxu0 %v2469_v56 }
 0xb1b   :  { %2019 = vmatprep.subr.bf16.mxu0 %v2320_v1  ;;  %2006 = vmatpush3.bf16.msra.mxu1 %v2451_v49 }
 0xb1c   :  { %2011 = vmatprep.subr.bf16.mxu1 %v2320_v1  ;;  %v855_v5 = vpop.permute.xlu0 %854 }
 0xb21   :  { %1992 = vmatmul.mubr.msk.bf16.vlgmr.msra.gmra.mrb[16].mxu0 %vm136_vm1, %v855_v5 }
 0xb22   :  { %2020 = vmatpush3.bf16.msra.mxu0 %v2382_v0  ;;  %2023 = vmatprep.mubr.msk.bf16.mxu0 %vm2321_vm0, %v2320_v1 }
 0xb23   :  { %2021 = vmatprep.subr.bf16.mxu0 %v2320_v1 }
 0xb25   :  { %v60_v7 = vpop.permute.xlu1 %59 }
 0xb26   :  { %2022 = vmatpush3.bf16.msra.mxu0 %v2390_v2  ;;  %v67_v38 = vmul.f32 %v2416_v14, %v60_v7 }
 0xb27   :  { %2027 = vmatprep.subr.bf16.mxu0 %v2320_v1 }
 0xb28   :  { %v75_v40 = vadd.f32 %v2424_v19, %v67_v38 }
 0xb2a   :  { %v98_v41 = vpop.permute.xlu1 %97 }
 0xb2b   :  { %v105_v43 = vmul.f32 %v2427_v23, %v98_v41 }
 0xb2d   :  { %v82_v39 = vpop.permute.xlu0 %81 }
 0xb2e   :  { %v89_v36 = vmul.f32 %v2419_v18, %v82_v39 }
 0xb30   :  { %v91_v42 = vadd.f32 %v89_v36, %v75_v40 }
 0xb32   :  { %v114_v44 = vpop.permute.xlu0 %113  ;;  %v107_v45 = vadd.f32 %v105_v43, %v91_v42 }
 0xb33   :  { %v121_v46 = vmul.f32 %v2431_v28, %v114_v44 }
 0xb35   :  { %v2620_v47 = vadd.f32 %v121_v46, %v107_v45 }
 0xbe8   :  { %v958_v50 = vpop.f32.mrb[12].mxu1 }
 0xbe9   :  { %v964_v51 = vadd.f32 %v958_v50, %v2620_v47  ;;  %v2001_v52 = vpop.f32.mrb[13].mxu1 }
 0xbea   :  { %v961_v14 = vpop.f32.mrb[14].mxu1 }
 0xbeb   :  { %2219 = vtanh.f32 %v964_v51  ;;  %v2002_v53 = vpop.f32.mrb[15].mxu1  ;;  %v1801_v59 = vmul.f32 -1.442695, %v964_v51 }
 0xbf4   :  { %v893_v19 = vpop.f32.mrb[16].mxu0 }
 0xbf5   :  { %v2220_v55 = vpop.eup %2219  ;;  %v2102_v18 = vadd.f32 %v2493_v63, %v893_v19  ;;  %v1993_v57 = vpop.f32.mrb[17].mxu0 }
 0xbf6   :  { %v896_v58 = vpop.f32.mrb[18].mxu0  ;;  %977 = vrot.lane.b32.xlu1 %v2220_v55, %s2326_s1 }
 0xbf7   :  { %2221 = vtanh.f32 %v2102_v18  ;;  %v1994_v23 = vpop.f32.mrb[19].mxu0  ;;  %v1799_v60 = vmul.f32 -1.442695, %v2102_v18 }
 0xbf8   :  { %2223 = vpow2.f32 %v1801_v59 }
 0xbf9   :  { %2225 = vpow2.f32 %v1799_v60 }
 0xc01   :  { %v2222_v28 = vpop.eup %2221 }
 0xc02   :  { %909 = vrot.lane.b32.xlu1 %v2222_v28, %s2326_s1  ;;  %v2224_v61 = vpop.eup %2223 }
 0xc03   :  { %v968_v62 = vadd.f32 1.0, %v2224_v61  ;;  %v2226_v32 = vpop.eup %2225 }
 0xc04   :  { %v903_v3 = vadd.f32 1.0, %v2226_v32 }
 0xc05   :  { %2227 = vrcp.f32 %v968_v62 }
 0xc06   :  { %2229 = vrcp.f32 %v903_v3 }
 0xc0f   :  { %v2228_v4 = vpop.eup %2227 }
 0xc10   :  { %v2230_v9 = vpop.eup %2229  ;;  %v975_v13 = vmul.f32 %v2228_v4, %v973_v12 }
 0xc11   :  { %v907_v20 = vmul.f32 %v2230_v9, %v2582_v22 }
 0xc68   :  { %v978_v6 = vpop.permute.xlu1 %977 }
 0xc69   :  { %v980_v8 = vmul.f32 %v2228_v4, %v978_v6 }
 0xc6b   :  { %982 = vrot.lane.b32.xlu0 %v980_v8, %s2326_s1 }
 0xc74   :  { %v910_v10 = vpop.permute.xlu1 %909 }
 0xc75   :  { %v912_v11 = vmul.f32 %v2230_v9, %v910_v10 }
 0xc77   :  { %914 = vrot.lane.b32.xlu1 %v912_v11, %s2326_s1 }
 0xcdd   :  { %v983_v15 = vpop.permute.xlu0 %982 }
 0xcde   :  { %v2629_v16 = vadd.f32 %v983_v15, %v975_v13 }
 0xce0   :  { %2231 = vtanh.f32 %v2629_v16  ;;  %v1164_v58 = vrot.slane %v2629_v16, 6  ;;  %v2291_v16 = vld [vmem:[%s2794_s2] sm:$0xff]  }
 0xce9   :  { %v915_v21 = vpop.permute.xlu1 %914 }
 0xcea   :  { %v2232_v24 = vpop.eup %2231  ;;  %v2633_v25 = vadd.f32 %v915_v21, %v907_v20  ;;  %v2292_v20 = vld [vmem:[%s2794_s2 + $0x8] sm:$0xff]  }
 0xceb   :  { %988 = vrot.lane.b32.xlu0 %v2232_v24, %s2326_s1 }
 0xcec   :  { %2233 = vtanh.f32 %v2633_v25 }
 0xcf6   :  { %v2234_v26 = vpop.eup %2233 }
 0xcf7   :  { %920 = vrot.lane.b32.xlu1 %v2234_v26, %s2326_s1 }
 0xd5d   :  { %v989_v17 = vpop.permute.xlu0 %988 }
 0xd5e   :  { %v991_v27 = vmul.f32 %v2228_v4, %v989_v17 }
 0xd60   :  { %v992_v29 = vpack.c.bf16 %v991_v27, %v991_v27 }
 0xd62   :  { %994 = vrot.lane.b32.xlu0 %v992_v29, %s2327_s22 }
 0xd69   :  { %v921_v31 = vpop.permute.xlu1 %920 }
 0xd6a   :  { %v923_v30 = vmul.f32 %v2230_v9, %v921_v31 }
 0xd6c   :  { %v1040_v34 = vpack.c.bf16 %v923_v30, %v923_v30 }
 0xd6e   :  { %1042 = vrot.lane.b32.xlu1 %v1040_v34, %s2327_s22 }
 0xdd4   :  { %v995_v22 = vpop.permute.xlu0 %994 }
 0xdd5   :  { %2008 = vmatmul.mubr.msk.bf16.vlgmr.msra.gmra.mrb[16].mxu1 %vm136_vm1, %v995_v22  ;;  %2024 = vmatmul.mubr.msk.bf16.vlgmr.msra.gmra.mrb[20].mxu0 %vm136_vm1, %v995_v22 }
 0xdd6   :  { %2012 = vmatpush3.bf16.msra.mxu1 %v2461_v54  ;;  %2015 = vmatprep.mubr.msk.bf16.mxu1 %vm2321_vm0, %v2320_v1 }
 0xdd7   :  { %2013 = vmatprep.subr.bf16.mxu1 %v2320_v1  ;;  %2028 = vmatpush3.bf16.msra.mxu0 %v2445_v48 }
 0xdd8   :  { %2029 = vmatprep.subr.bf16.mxu0 %v2320_v1  ;;  %2031 = vmatprep.mubr.msk.bf16.mxu0 %vm2321_vm0, %v2320_v1 }
 0xdda   :  { %2014 = vmatpush3.bf16.msra.mxu1 %v2469_v56 }
 0xddb   :  { %2043 = vmatprep.subr.bf16.mxu1 %v2320_v1  ;;  %2030 = vmatpush3.bf16.msra.mxu0 %v2451_v49 }
 0xddc   :  { %2035 = vmatprep.subr.bf16.mxu0 %v2320_v1 }
 0xde0   :  { %v1043_v33 = vpop.permute.xlu1 %1042 }
 0xde1   :  { %2016 = vmatmul.mubr.msk.bf16.vlgmr.msra.gmra.mrb[16].mxu1 %vm136_vm1, %v1043_v33 }
 0xde2   :  { %2044 = vmatpush3.bf16.msra.mxu1 %v2382_v0  ;;  %2047 = vmatprep.mubr.msk.bf16.mxu1 %vm2321_vm0, %v2320_v1 }
 0xde3   :  { %2045 = vmatprep.subr.bf16.mxu1 %v2320_v1 }
 0xde6   :  { %2046 = vmatpush3.bf16.msra.mxu1 %v2390_v2 }
 0xde7   :  { %2051 = vmatprep.subr.bf16.mxu1 %v2320_v1 }
 0xea8   :  { %v1146_v35 = vpop.f32.mrb[20].mxu0 }
 0xea9   :  { %v1153_v37 = vrot.slane %v1146_v35, 6  ;;  %v2025_v5 = vpop.f32.mrb[21].mxu0 }
 0xeaa   :  { %v1149_v7 = vpop.f32.mrb[22].mxu0 }
 0xeab   :  { %v1155_v38 = vadd.f32 %v1153_v37, %v2620_v47  ;;  %v2026_v39 = vpop.f32.mrb[23].mxu0 }
 0xead   :  { %2235 = vtanh.f32 %v1155_v38  ;;  %v1806_v44 = vmul.f32 -1.442695, %v1155_v38 }
 0xeb4   :  { %v1081_v40 = vpop.f32.mrb[16].mxu1 }
 0xeb5   :  { %v2103_v0 = vadd.f32 %v2493_v63, %v1081_v40  ;;  %v2017_v36 = vpop.f32.mrb[17].mxu1 }
 0xeb6   :  { %v1084_v41 = vpop.f32.mrb[18].mxu1 }
 0xeb7   :  { %v2236_v42 = vpop.eup %2235  ;;  %2237 = vtanh.f32 %v2103_v0  ;;  %v2018_v43 = vpop.f32.mrb[19].mxu1  ;;  %v1804_v45 = vmul.f32 -1.442695, %v2103_v0 }
 0xeb8   :  { %1168 = vrot.lane.b32.xlu0 %v2236_v42, %s2326_s1  ;;  %2239 = vpow2.f32 %v1806_v44 }
 0xeb9   :  { %2241 = vpow2.f32 %v1804_v45 }
 0xec1   :  { %v2238_v2 = vpop.eup %2237 }
 0xec2   :  { %1097 = vrot.lane.b32.xlu1 %v2238_v2, %s2326_s1  ;;  %v2240_v46 = vpop.eup %2239 }
 0xec3   :  { %v1159_v50 = vadd.f32 1.0, %v2240_v46  ;;  %v2242_v51 = vpop.eup %2241 }
 0xec4   :  { %v1091_v52 = vadd.f32 1.0, %v2242_v51 }
 0xec5   :  { %2243 = vrcp.f32 %v1159_v50 }
 0xec6   :  { %2245 = vrcp.f32 %v1091_v52 }
 0xecf   :  { %v2244_v14 = vpop.eup %2243 }
 0xed0   :  { %v2246_v55 = vpop.eup %2245  ;;  %v1166_v23 = vmul.f32 %v2244_v14, %v1164_v58 }
 0xed1   :  { %v1095_v60 = vmul.f32 %v2246_v55, %v2633_v25 }
 0xf2a   :  { %v1169_v53 = vpop.permute.xlu0 %1168 }
 0xf2b   :  { %v1171_v19 = vmul.f32 %v2244_v14, %v1169_v53 }
 0xf2d   :  { %1173 = vrot.lane.b32.xlu0 %v1171_v19, %s2326_s1 }
 0xf34   :  { %v1098_v18 = vpop.permute.xlu1 %1097 }
 0xf35   :  { %v1100_v57 = vmul.f32 %v2246_v55, %v1098_v18 }
 0xf37   :  { %1102 = vrot.lane.b32.xlu1 %v1100_v57, %s2326_s1 }
 0xf9f   :  { %v1174_v28 = vpop.permute.xlu0 %1173 }
 0xfa0   :  { %v2668_v59 = vadd.f32 %v1174_v28, %v1166_v23 }
 0xfa2   :  { %2247 = vtanh.f32 %v2668_v59  ;;  %v1356_v44 = vrot.slane %v2668_v59, 6 }
 0xfa9   :  { %v1103_v61 = vpop.permute.xlu1 %1102 }
 0xfaa   :  { %v2672_v62 = vadd.f32 %v1103_v61, %v1095_v60 }
 0xfac   :  { %v2248_v32 = vpop.eup %2247  ;;  %2249 = vtanh.f32 %v2672_v62 }
 0xfad   :  { %1179 = vrot.lane.b32.xlu0 %v2248_v32, %s2326_s1 }
 0xfb6   :  { %v2250_v3 = vpop.eup %2249 }
 0xfb7   :  { %1108 = vrot.lane.b32.xlu1 %v2250_v3, %s2326_s1 }
0x101f   :  { %v1180_v4 = vpop.permute.xlu0 %1179 }
0x1020   :  { %v1182_v6 = vmul.f32 %v2244_v14, %v1180_v4 }
0x1022   :  { %v1183_v8 = vpack.c.bf16 %v1182_v6, %v1182_v6 }
0x1024   :  { %v1185_v9 = vrot.slane %v1183_v8, 1 }
0x1026   :  { %1186 = vrot.lane.b32.xlu0 %v1185_v9, %s2327_s22 }
0x1029   :  { %v1109_v10 = vpop.permute.xlu1 %1108 }
0x102a   :  { %v1111_v11 = vmul.f32 %v2246_v55, %v1109_v10 }
0x102c   :  { %v1232_v12 = vpack.c.bf16 %v1111_v11, %v1111_v11 }
0x102e   :  { %1234 = vrot.lane.b32.xlu1 %v1232_v12, %s2327_s22 }
0x1098   :  { %v1187_v13 = vpop.permute.xlu0 %1186 }
0x1099   :  { %2032 = vmatmul.mubr.msk.bf16.vlgmr.msra.gmra.mrb[24].mxu0 %vm136_vm1, %v1187_v13  ;;  %2048 = vmatmul.mubr.msk.bf16.vlgmr.msra.gmra.mrb[20].mxu1 %vm136_vm1, %v1187_v13 }
0x109a   :  { %2036 = vmatpush3.bf16.msra.mxu0 %v2461_v54  ;;  %2039 = vmatprep.mubr.msk.bf16.mxu0 %vm2321_vm0, %v2320_v1 }
0x109b   :  { %2037 = vmatprep.subr.bf16.mxu0 %v2320_v1  ;;  %2052 = vmatpush3.bf16.msra.mxu1 %v2445_v48 }
0x109c   :  { %2053 = vmatprep.subr.bf16.mxu1 %v2320_v1  ;;  %2055 = vmatprep.mubr.msk.bf16.mxu1 %vm2321_vm0, %v2320_v1 }
0x109e   :  { %2038 = vmatpush3.bf16.msra.mxu0 %v2469_v56 }
0x109f   :  { %2067 = vmatprep.subr.bf16.mxu0 %v2320_v1  ;;  %2054 = vmatpush3.bf16.msra.mxu1 %v2451_v49 }
0x10a0   :  { %2059 = vmatprep.subr.bf16.mxu1 %v2320_v1  ;;  %v1235_v15 = vpop.permute.xlu1 %1234 }
0x10a5   :  { %2040 = vmatmul.mubr.msk.bf16.vlgmr.msra.gmra.mrb[24].mxu0 %vm136_vm1, %v1235_v15 }
0x10a6   :  { %2068 = vmatpush3.bf16.msra.mxu0 %v2291_v16  ;;  %2071 = vmatprep.mubr.msk.bf16.mxu0 %vm2321_vm0, %v2320_v1 }
0x10a7   :  { %2069 = vmatprep.subr.bf16.mxu0 %v2320_v1 }
0x10aa   :  { %2070 = vmatpush3.bf16.msra.mxu0 %v2292_v20 }
0x10ab   :  { %2075 = vmatprep.subr.bf16.mxu0 %v2320_v1 }
0x116c   :  { %v1338_v21 = vpop.f32.mrb[20].mxu1 }
0x116d   :  { %v1345_v24 = vrot.slane %v1338_v21, 4  ;;  %v2049_v25 = vpop.f32.mrb[21].mxu1 }
0x116e   :  { %v1341_v26 = vpop.f32.mrb[22].mxu1 }
0x116f   :  { %v1347_v17 = vadd.f32 %v1345_v24, %v2620_v47  ;;  %v2050_v27 = vpop.f32.mrb[23].mxu1 }
0x1171   :  { %2251 = vtanh.f32 %v1347_v17  ;;  %v1811_v37 = vmul.f32 -1.442695, %v1347_v17 }
0x1178   :  { %v1273_v29 = vpop.f32.mrb[24].mxu0 }
0x1179   :  { %v2104_v31 = vadd.f32 %v2493_v63, %v1273_v29  ;;  %v2041_v30 = vpop.f32.mrb[25].mxu0 }
0x117a   :  { %v1276_v34 = vpop.f32.mrb[26].mxu0 }
0x117b   :  { %v2252_v22 = vpop.eup %2251  ;;  %2253 = vtanh.f32 %v2104_v31  ;;  %v2042_v33 = vpop.f32.mrb[27].mxu0  ;;  %v1809_v5 = vmul.f32 -1.442695, %v2104_v31 }
0x117c   :  { %1360 = vrot.lane.b32.xlu0 %v2252_v22, %s2326_s1  ;;  %2255 = vpow2.f32 %v1811_v37 }
0x117d   :  { %2257 = vpow2.f32 %v1809_v5 }
0x1185   :  { %v2254_v35 = vpop.eup %2253 }
0x1186   :  { %1289 = vrot.lane.b32.xlu1 %v2254_v35, %s2326_s1  ;;  %v2256_v7 = vpop.eup %2255 }
0x1187   :  { %v1351_v38 = vadd.f32 1.0, %v2256_v7  ;;  %v2258_v39 = vpop.eup %2257 }
0x1188   :  { %v1283_v40 = vadd.f32 1.0, %v2258_v39 }
0x1189   :  { %2259 = vrcp.f32 %v1351_v38 }
0x118a   :  { %2261 = vrcp.f32 %v1283_v40 }
0x1193   :  { %v2260_v0 = vpop.eup %2259 }
0x1194   :  { %v2262_v42 = vpop.eup %2261  ;;  %v1358_v45 = vmul.f32 %v2260_v0, %v1356_v44 }
0x1195   :  { %v1287_v51 = vmul.f32 %v2262_v42, %v2672_v62 }
0x11ee   :  { %v1361_v36 = vpop.permute.xlu0 %1360 }
0x11ef   :  { %v1363_v41 = vmul.f32 %v2260_v0, %v1361_v36 }
0x11f1   :  { %1365 = vrot.lane.b32.xlu0 %v1363_v41, %s2326_s1 }
0x11f8   :  { %v1290_v43 = vpop.permute.xlu1 %1289 }
0x11f9   :  { %v1292_v2 = vmul.f32 %v2262_v42, %v1290_v43  ;;  %v2294_v43 = vld [vmem:[%s2797_s5 + $0x8] sm:$0xff]  }
0x11fb   :  { %1294 = vrot.lane.b32.xlu1 %v1292_v2, %s2326_s1 }
0x1263   :  { %v1366_v46 = vpop.permute.xlu0 %1365 }
0x1264   :  { %v2711_v50 = vadd.f32 %v1366_v46, %v1358_v45  ;;  %v2295_v45 = vld [vmem:[%s2798_s6] ss:$0 sm:$0xff] }
0x1266   :  { %2263 = vtanh.f32 %v2711_v50  ;;  %v1548_v27 = vrot.slane %v2711_v50, 6 }
0x126d   :  { %v1295_v52 = vpop.permute.xlu1 %1294 }
0x126e   :  { %v2715_v14 = vadd.f32 %v1295_v52, %v1287_v51 }
0x1270   :  { %v2264_v53 = vpop.eup %2263  ;;  %2265 = vtanh.f32 %v2715_v14 }
0x1271   :  { %1371 = vrot.lane.b32.xlu0 %v2264_v53, %s2326_s1 }
0x127a   :  { %v2266_v19 = vpop.eup %2265 }
0x127b   :  { %1300 = vrot.lane.b32.xlu1 %v2266_v19, %s2326_s1 }
0x12e3   :  { %v1372_v55 = vpop.permute.xlu0 %1371 }
0x12e4   :  { %v1374_v18 = vmul.f32 %v2260_v0, %v1372_v55 }
0x12e6   :  { %v1375_v57 = vpack.c.bf16 %v1374_v18, %v1374_v18 }
0x12e8   :  { %v1377_v58 = vrot.slane %v1375_v57, 2 }
0x12ea   :  { %1378 = vrot.lane.b32.xlu0 %v1377_v58, %s2327_s22 }
0x12ed   :  { %v1301_v23 = vpop.permute.xlu1 %1300 }
0x12ee   :  { %v1303_v28 = vmul.f32 %v2262_v42, %v1301_v23  ;;  %v2293_v42 = vld [vmem:[%s2797_s5] sm:$0xff]  }
0x12f0   :  { %v1424_v59 = vpack.c.bf16 %v1303_v28, %v1303_v28 }
0x12f2   :  { %1426 = vrot.lane.b32.xlu1 %v1424_v59, %s2327_s22 }
0x135c   :  { %v1379_v60 = vpop.permute.xlu0 %1378 }
0x135d   :  { %2056 = vmatmul.mubr.msk.bf16.vlgmr.msra.gmra.mrb[24].mxu1 %vm136_vm1, %v1379_v60  ;;  %2072 = vmatmul.mubr.msk.bf16.vlgmr.msra.gmra.mrb[28].mxu0 %vm136_vm1, %v1379_v60  ;;  %v2161_v60 = vld [vmem:[%s2799_s7] sm:$0xff]  }
0x135e   :  { %2060 = vmatpush3.bf16.msra.mxu1 %v2461_v54  ;;  %2063 = vmatprep.mubr.msk.bf16.mxu1 %vm2321_vm0, %v2320_v1 }
0x135f   :  { %2061 = vmatprep.subr.bf16.mxu1 %v2320_v1  ;;  %2076 = vmatpush3.bf16.msra.mxu0 %v2445_v48 }
0x1360   :  { %2077 = vmatprep.subr.bf16.mxu0 %v2320_v1  ;;  %2079 = vmatprep.mubr.msk.bf16.mxu0 %vm2321_vm0, %v2320_v1 }
0x1362   :  { %2062 = vmatpush3.bf16.msra.mxu1 %v2469_v56 }
0x1363   :  { %2078 = vmatpush3.bf16.msra.mxu0 %v2451_v49  ;;  %2091 = vmatprep.subr.bf16.mxu1 %v2320_v1 }
0x1364   :  { %2083 = vmatprep.subr.bf16.mxu0 %v2320_v1  ;;  %v1427_v54 = vpop.permute.xlu1 %1426 }
0x1369   :  { %2064 = vmatmul.mubr.msk.bf16.vlgmr.msra.gmra.mrb[24].mxu1 %vm136_vm1, %v1427_v54  ;;  %v2162_v54 = vld [vmem:[%s2799_s7 + $0x8] sm:$0xff]   ;;  %s1766_s7 = sshll.u32 %s2328_s20, 4  ;;  %s1767_s7 = int_to_ptr.vmem [resolvable:$true] %s1766_s7 }
0x136a   :  { %2095 = vmatprep.mubr.msk.bf16.mxu1 %vm2321_vm0, %v2320_v1  ;;  %2092 = vmatpush3.bf16.msra.mxu1 %v2161_v60  ;;  %p2301_p1 = scmp.lt.s32.totalorder %s1767_s7, %s1767_s7 }
0x136b   :  { %2093 = vmatprep.subr.bf16.mxu1 %v2320_v1 }
0x136e   :  { %2094 = vmatpush3.bf16.msra.mxu1 %v2162_v54 }
0x1430   :  { %v1530_v48 = vpop.f32.mrb[28].mxu0 }
0x1431   :  { %v1537_v61 = vrot.slane %v1530_v48, 2  ;;  %v2073_v62 = vpop.f32.mrb[29].mxu0 }
0x1432   :  { %v1533_v32 = vpop.f32.mrb[30].mxu0 }
0x1433   :  { %v1539_v3 = vadd.f32 %v1537_v61, %v2620_v47  ;;  %v2074_v4 = vpop.f32.mrb[31].mxu0 }
0x1434   :  { %v1820_v4 = vld [vmem:[%s2800_s8] ss:$0 sm:$0xff] }
0x1435   :  { %2267 = vtanh.f32 %v1539_v3  ;;  %v1816_v12 = vmul.f32 -1.442695, %v1539_v3 }
0x143c   :  { %v1465_v56 = vpop.f32.mrb[24].mxu1 }
0x143d   :  { %v2105_v49 = vadd.f32 %v2493_v63, %v1465_v56  ;;  %v2065_v6 = vpop.f32.mrb[25].mxu1 }
0x143e   :  { %v1468_v8 = vpop.f32.mrb[26].mxu1 }
0x143f   :  { %v2268_v9 = vpop.eup %2267  ;;  %2269 = vtanh.f32 %v2105_v49  ;;  %v2066_v10 = vpop.f32.mrb[27].mxu1  ;;  %v1814_v13 = vmul.f32 -1.442695, %v2105_v49 }
0x1440   :  { %1552 = vrot.lane.b32.xlu0 %v2268_v9, %s2326_s1  ;;  %2271 = vpow2.f32 %v1816_v12 }
0x1441   :  { %2273 = vpow2.f32 %v1814_v13 }
0x1449   :  { %v2270_v11 = vpop.eup %2269 }
0x144a   :  { %1481 = vrot.lane.b32.xlu1 %v2270_v11, %s2326_s1  ;;  %v2272_v15 = vpop.eup %2271 }
0x144b   :  { %v1543_v47 = vadd.f32 1.0, %v2272_v15  ;;  %v2274_v16 = vpop.eup %2273 }
0x144c   :  { %v1475_v20 = vadd.f32 1.0, %v2274_v16 }
0x144d   :  { %2275 = vrcp.f32 %v1543_v47 }
0x144e   :  { %2277 = vrcp.f32 %v1475_v20 }
0x1457   :  { %v2276_v63 = vpop.eup %2275 }
0x1458   :  { %v2278_v25 = vpop.eup %2277  ;;  %v1550_v29 = vmul.f32 %v2276_v63, %v1548_v27 }
0x1459   :  { %v1479_v34 = vmul.f32 %v2278_v25, %v2715_v14 }
0x14b2   :  { %v1553_v21 = vpop.permute.xlu0 %1552 }
0x14b3   :  { %v1555_v24 = vmul.f32 %v2276_v63, %v1553_v21 }
0x14b5   :  { %1557 = vrot.lane.b32.xlu0 %v1555_v24, %s2326_s1 }
0x14bc   :  { %v1482_v26 = vpop.permute.xlu1 %1481 }
0x14bd   :  { %v1484_v17 = vmul.f32 %v2278_v25, %v1482_v26 }
0x14bf   :  { %1486 = vrot.lane.b32.xlu1 %v1484_v17, %s2326_s1 }
0x1527   :  { %v1558_v31 = vpop.permute.xlu0 %1557 }
0x1528   :  { %v1560_v30 = vadd.f32 %v1558_v31, %v1550_v29 }
0x152a   :  { %2279 = vtanh.f32 %v1560_v30 }
0x1531   :  { %v1487_v22 = vpop.permute.xlu1 %1486 }
0x1532   :  { %v1489_v33 = vadd.f32 %v1487_v22, %v1479_v34 }
0x1534   :  { %v2280_v35 = vpop.eup %2279  ;;  %2281 = vtanh.f32 %v1489_v33 }
0x1535   :  { %1563 = vrot.lane.b32.xlu0 %v2280_v35, %s2326_s1 }
0x153e   :  { %v2282_v37 = vpop.eup %2281 }
0x153f   :  { %1492 = vrot.lane.b32.xlu1 %v2282_v37, %s2326_s1 }
0x15a7   :  { %v1564_v5 = vpop.permute.xlu0 %1563 }
0x15a8   :  { %v1566_v7 = vmul.f32 %v2276_v63, %v1564_v5 }
0x15aa   :  { %v1567_v38 = vpack.c.bf16 %v1566_v7, %v1566_v7 }
0x15ac   :  { %v1569_v39 = vrot.slane %v1567_v38, 3 }
0x15ae   :  { %1570 = vrot.lane.b32.xlu0 %v1569_v39, %s2327_s22 }
0x15b1   :  { %v1493_v40 = vpop.permute.xlu1 %1492 }
0x15b2   :  { %v1495_v0 = vmul.f32 %v2278_v25, %v1493_v40 }
0x15b4   :  { %v1616_v36 = vpack.c.bf16 %v1495_v0, %v1495_v0 }
0x15b6   :  { %1618 = vrot.lane.b32.xlu1 %v1616_v36, %s2327_s22 }
0x1620   :  { %v1571_v41 = vpop.permute.xlu0 %1570 }
0x1621   :  { %2080 = vmatmul.mubr.msk.bf16.vlgmr.msra.gmra.mrb[32].mxu0 %vm136_vm1, %v1571_v41 }
0x1622   :  { %2084 = vmatpush3.bf16.msra.mxu0 %v2293_v42  ;;  %2087 = vmatprep.mubr.msk.bf16.mxu0 %vm2321_vm0, %v2320_v1 }
0x1623   :  { %2085 = vmatprep.subr.bf16.mxu0 %v2320_v1 }
0x1626   :  { %2086 = vmatpush3.bf16.msra.mxu0 %v2294_v43 }
0x1628   :  { %v1619_v2 = vpop.permute.xlu1 %1618 }
0x162d   :  { %2088 = vmatmul.mubr.msk.bf16.vlgmr.msra.gmra.mrb[32].mxu0 %vm136_vm1, %v1619_v2 }
0x1700   :  { %v1657_v44 = vpop.f32.mrb[32].mxu0 }
0x1701   :  { %v2106_v46 = vadd.f32 %v2295_v45, %v1657_v44  ;;  %v2089_v50 = vpop.f32.mrb[33].mxu0 }
0x1702   :  { %v1660_v51 = vpop.f32.mrb[34].mxu0 }
0x1703   :  { %2283 = vtanh.f32 %v2106_v46  ;;  %v2090_v52 = vpop.f32.mrb[35].mxu0  ;;  %v1819_v53 = vmul.f32 -1.442695, %v2106_v46 }
0x1705   :  { %2285 = vpow2.f32 %v1819_v53 }
0x170d   :  { %v2284_v14 = vpop.eup %2283 }
0x170e   :  { %1673 = vrot.lane.b32.xlu0 %v2284_v14, %s2326_s1 }
0x170f   :  { %v2286_v19 = vpop.eup %2285 }
0x1710   :  { %v1667_v55 = vadd.f32 1.0, %v2286_v19 }
0x1712   :  { %2287 = vrcp.f32 %v1667_v55 }
0x171c   :  { %v2288_v18 = vpop.eup %2287 }
0x171d   :  { %v1671_v23 = vmul.f32 %v2288_v18, %v1489_v33 }
0x1780   :  { %v1674_v57 = vpop.permute.xlu0 %1673 }
0x1781   :  { %v1676_v58 = vmul.f32 %v2288_v18, %v1674_v57 }
0x1783   :  { %1678 = vrot.lane.b32.xlu1 %v1676_v58, %s2326_s1 }
0x17f5   :  { %v1679_v28 = vpop.permute.xlu1 %1678 }
0x17f6   :  { %v1681_v59 = vadd.f32 %v1679_v28, %v1671_v23 }
0x17f8   :  { %2289 = vtanh.f32 %v1681_v59 }
0x1802   :  { %v2290_v48 = vpop.eup %2289 }
0x1803   :  { %1684 = vrot.lane.b32.xlu0 %v2290_v48, %s2326_s1  ;;  %s2296_s1 = scalar_lea.vmem %s1767_s7, 32 }
0x1804   :  { %p2297_p0 = scmp.ne.s32.totalorder %s1767_s7, %s2296_s1  ;;  %p2302_p2 = scmp.lt.s32.totalorder %s2296_s1, %s2296_s1 }
0x1806   :  { %p2303_p3 = por %p2302_p2, %p2301_p1 }
0x1808   :  { %p2304_p4 = pnand %p2303_p3, %p2297_p0 }
0x1875   :  { %v1685_v61 = vpop.permute.xlu0 %1684 }
0x1876   :  { %v1687_v62 = vmul.f32 %v2288_v18, %v1685_v61 }
0x1878   :  { %v1688_v32 = vpack.c.bf16 %v1687_v62, %v1687_v62 }
0x187a   :  { %1701 = vrot.lane.b32.xlu1 %v1688_v32, %s2327_s22 }
0x18ec   :  { %v1702_v3 = vpop.permute.xlu1 %1701 }
0x18ed   :  { %2096 = vmatmul.mubr.msk.bf16.vlgmr.msra.gmra.mrb[28].mxu1 %vm136_vm1, %v1702_v3 }
0x19c0   :  { %v1752_v56 = vpop.f32.mrb[28].mxu1 }
0x19c1   :  { %v1753_v1 = vadd.f32 %v1820_v4, %v1752_v56  ;;  %v2097_v49 = vpop.f32.mrb[29].mxu1 }
0x19c2   :  { %v1755_v6 = vpop.f32.mrb[30].mxu1 }
0x19c3   :  { %v2098_v8 = vpop.f32.mrb[31].mxu1  ;;  %1759 = vst.msk [vmem:[#allocation2] sm:$0x3] %vm1758_vm2, %v1753_v1 }
0x19c4   :  { %2307 = shalt.err (!%p2304_p4)
}
0x19c5   :  { %s2308_s8 = scalar_lea.hbm %s2801_s9, 32 }
0x19c6   :  { %p2309_p5 = scmp.ne.s32.totalorder %s2801_s9, %s2308_s8  ;;  %p2312_p6 = scmp.lt.u32.totalorder %s2308_s8, %s2801_s9 }
0x19c8   :  { %p2314_p7 = pnand %p2312_p6, %p2309_p5 }
0x19ca   :  { %2317 = shalt.err (!%p2314_p7)
}
0x19cb   :  { %1769 = dma.vmem_to_hbm [thread:$0]  %s1767_s7, 32, %s2801_s9, [#allocation3]  }
0x19cc   :  { %2318 = dma.done.wait [#allocation3], 32  }
0x19cd   :  { %2319 = vsyncadd [#allocation3], 4294967264 }
0x19ce   :  { %1773 = vsyncpa [#allocation3], 1 }

</bundles_post_ra>
